<compile_context>
chip_gen: v7x
topology: tpu7x:2x2x1
jax: 0.10.0
libtpu: 0.0.40
codegen_flags: <defaults>
</compile_context>

<pallas_src>
import math

import jax
import jax.numpy as jnp
from jax.experimental import pallas as pl
from jax.experimental.pallas import tpu as pltpu

IN_F = 784
H1 = 512
H2 = 256
OUT_PAD = 128          # lane-dense output block; the real logit is column 0
MAX_TILE_B = 1024      # review: 1024-2048; 1024 keeps VMEM comfortable on v7x (64 MiB)


def _round_up(x, m):
    return (x + m - 1) // m * m


def _pick_tile_b(B):
    """Padding-aware batch tile: multiple of 16 (bf16 sublanes), >=2 grid steps when
    B >= 256 (v7x megacore), batch padding kept under ~12.5%."""
    if B <= 128:
        return _round_up(B, 16)          # single small tile
    if B <= 256:
        return 128                       # >=2 steps so both v7x TCs get work
    best = 128
    for t in (256, 512, 1024):
        b_pad = _round_up(B, t)
        if b_pad // t < 2:               # keep >=2 grid steps
            break
        if (b_pad - B) * 8 <= B:         # padding waste <= ~12.5%
            best = t
    return best


def _disc_kernel(x_ref, w1_ref, b1_ref, w2_ref, b2_ref, w3_ref, b3_ref, o_ref):
    # bf16 cast inside the kernel (x streamed from HBM in its native f32 layout).
    x = x_ref[...].astype(jnp.bfloat16)

    # Layer 1: (TB, 784)bf16 @ (784, 512)bf16 -> f32 accumulator
    h1 = jnp.dot(x, w1_ref[...], preferred_element_type=jnp.float32) + b1_ref[...]
    h1 = jnp.where(h1 >= 0, h1, 0.2 * h1).astype(jnp.bfloat16)   # LeakyReLU(0.2)

    # Layer 2: (TB, 512)bf16 @ (512, 256)bf16 -> f32
    h2 = jnp.dot(h1, w2_ref[...], preferred_element_type=jnp.float32) + b2_ref[...]
    h2 = jnp.where(h2 >= 0, h2, 0.2 * h2).astype(jnp.bfloat16)   # LeakyReLU(0.2)

    # Layer 3: (TB, 256)bf16 @ (256, 128)bf16 -> f32 ; lane-dense store, col 0 = logit
    out = jnp.dot(h2, w3_ref[...], preferred_element_type=jnp.float32) + b3_ref[...]
    o_ref[...] = out.astype(o_ref.dtype)


def prepare_params(params):
    """One-time (per-weight-update) layout plumbing: bf16 weights, last layer padded
    to a lane-dense 128-wide block.  Keep the result and reuse it across forwards."""
    w1, b1, w2, b2, w3, b3 = params
    w1_b = w1.astype(jnp.bfloat16)                                   # (784, 512)
    w2_b = w2.astype(jnp.bfloat16)                                   # (512, 256)
    w3_p = jnp.zeros((H2, OUT_PAD), jnp.bfloat16).at[:, :1].set(
        w3.astype(jnp.bfloat16))                                     # (256, 128)
    b3_p = jnp.zeros((1, OUT_PAD), jnp.float32).at[:, :1].set(
        b3.astype(jnp.float32))                                      # (1, 128)
    return (w1_b, b1.astype(jnp.float32), w2_b, b2.astype(jnp.float32), w3_p, b3_p)


def discriminator_forward(x, prep_params, *, max_tile_b=MAX_TILE_B):
    """x: (B, 784) float32.  prep_params: output of prepare_params().
    Returns (B, 1) float32 (bf16 compute, f32 MXU accumulation)."""
    w1, b1, w2, b2, w3, b3 = prep_params
    B = x.shape[0]

    tile_b = min(_pick_tile_b(B), max_tile_b)
    B_pad = _round_up(B, tile_b)
    if B_pad != B:
        # Row-pad only (rare: tile selection keeps waste small); no dtype round-trip.
        x = jnp.pad(x, ((0, B_pad - B), (0, 0)))

    grid = (B_pad // tile_b,)

    flops = 2 * B_pad * (IN_F * H1 + H1 * H2 + H2 * OUT_PAD)
    bytes_accessed = (
        B_pad * IN_F * 4                       # x streamed as f32
        + w1.size * 2 + w2.size * 2 + w3.size * 2
        + b1.size * 4 + b2.size * 4 + b3.size * 4
        + B_pad * OUT_PAD * 2                  # bf16 output writeback
    )

    out_full = pl.pallas_call(
        _disc_kernel,
        out_shape=jax.ShapeDtypeStruct((B_pad, OUT_PAD), jnp.bfloat16),
        grid=grid,
        in_specs=[
            pl.BlockSpec((tile_b, IN_F), lambda i: (i, 0)),   # x tile streams (f32)
            pl.BlockSpec((IN_F, H1), lambda i: (0, 0)),       # weights stay resident
            pl.BlockSpec((1, H1), lambda i: (0, 0)),
            pl.BlockSpec((H1, H2), lambda i: (0, 0)),
            pl.BlockSpec((1, H2), lambda i: (0, 0)),
            pl.BlockSpec((H2, OUT_PAD), lambda i: (0, 0)),
            pl.BlockSpec((1, OUT_PAD), lambda i: (0, 0)),
        ],
        out_specs=pl.BlockSpec((tile_b, OUT_PAD), lambda i: (i, 0)),
        compiler_params=pltpu.CompilerParams(
            dimension_semantics=("parallel",),       # batch axis -> 2 TCs on v7x
            vmem_limit_bytes=40 * 1024 * 1024,       # headroom vs v7x's 64 MiB physical
        ),
        cost_estimate=pl.CostEstimate(
            flops=flops, transcendentals=0, bytes_accessed=bytes_accessed),
    )(x, w1, b1, w2, b2, w3, b3)

    return out_full[:B, :1].astype(jnp.float32)


def init_params(key):
    """Deterministic init matching torch.nn.Linear default (U(-1/sqrt(fan_in), +)).
    Weights stored as (in_features, out_features); all f32."""
    sizes = [(IN_F, H1), (H1, H2), (H2, 1)]
    params = []
    for (fan_in, fan_out) in sizes:
        key, kw, kb = jax.random.split(key, 3)
        bound = 1.0 / math.sqrt(fan_in)
        w = jax.random.uniform(kw, (fan_in, fan_out), jnp.float32, -bound, bound)
        b = jax.random.uniform(kb, (1, fan_out), jnp.float32, -bound, bound)
        params += [w, b]
    return tuple(params)


def reference_forward(x, params):
    """Pure-f32 JAX reference matching the PyTorch module."""
    w1, b1, w2, b2, w3, b3 = params
    h = x @ w1 + b1
    h = jnp.where(h >= 0, h, 0.2 * h)
    h = h @ w2 + b2
    h = jnp.where(h >= 0, h, 0.2 * h)
    return h @ w3 + b3


if __name__ == "__main__":
    key = jax.random.PRNGKey(0)
    key, kx = jax.random.split(key)

    B = 16  # small demo batch; tile selection / padding handles any B
    x = jax.random.normal(kx, (B, IN_F), dtype=jnp.float32)

    params = init_params(key)
    prep = prepare_params(params)     # one-time padding/casting, hoisted out of forward

    out = discriminator_forward(x, prep)
    out = jax.block_until_ready(out)

    ref = reference_forward(x, params)
    assert out.shape == (B, 1), out.shape
    # bf16 compute with f32 accumulation: loose tolerance vs the f32 reference.
    assert jnp.allclose(out, ref, atol=5e-2, rtol=5e-2), "mismatch vs reference"

    print("KERNEL_OK")
</pallas_src>

<mosaic_0001>
module attributes {stable_mosaic.version = 11 : i64} {
  func.func @_disc_kernel(%arg0: i32, %arg1: memref<16x784xf32, #tpu.memory_space<vmem>>, %arg2: memref<784x512xbf16, #tpu.memory_space<vmem>>, %arg3: memref<1x512xf32, #tpu.memory_space<vmem>>, %arg4: memref<512x256xbf16, #tpu.memory_space<vmem>>, %arg5: memref<1x256xf32, #tpu.memory_space<vmem>>, %arg6: memref<256x128xbf16, #tpu.memory_space<vmem>>, %arg7: memref<1x128xf32, #tpu.memory_space<vmem>>, %arg8: memref<16x128xbf16, #tpu.memory_space<vmem>>) attributes {dimension_semantics = [#tpu.dimension_semantics<parallel>], iteration_bounds = array<i64: 1>, scalar_prefetch = 0 : i64, scratch_operands = 0 : i64, tpu.core_type = #tpu.core_type<tc>, window_params = [{transform_indices = @transform_0, window_bounds = array<i64: 16, 784>}, {pipeline_mode = #tpu.pipeline_mode<synchronous>, transform_indices = @transform_1, window_bounds = array<i64: 784, 512>}, {pipeline_mode = #tpu.pipeline_mode<synchronous>, transform_indices = @transform_2, window_bounds = array<i64: 1, 512>}, {pipeline_mode = #tpu.pipeline_mode<synchronous>, transform_indices = @transform_3, window_bounds = array<i64: 512, 256>}, {pipeline_mode = #tpu.pipeline_mode<synchronous>, transform_indices = @transform_4, window_bounds = array<i64: 1, 256>}, {pipeline_mode = #tpu.pipeline_mode<synchronous>, transform_indices = @transform_5, window_bounds = array<i64: 256, 128>}, {pipeline_mode = #tpu.pipeline_mode<synchronous>, transform_indices = @transform_6, window_bounds = array<i64: 1, 128>}, {transform_indices = @transform_7, window_bounds = array<i64: 16, 128>}]} {
    %c0 = arith.constant 0 : index
    %c0_0 = arith.constant 0 : index
    %0 = vector.load %arg1[%c0, %c0_0] : memref<16x784xf32, #tpu.memory_space<vmem>>, vector<16x784xf32>
    %1 = arith.truncf %0 : vector<16x784xf32> to vector<16x784xbf16>
    %c0_1 = arith.constant 0 : index
    %c0_2 = arith.constant 0 : index
    %2 = vector.load %arg2[%c0_1, %c0_2] : memref<784x512xbf16, #tpu.memory_space<vmem>>, vector<784x512xbf16>
    %cst = arith.constant dense<0.000000e+00> : vector<16x512xf32>
    %3 = tpu.matmul %1, %2, %cst {dimension_numbers = #tpu.dot_dimension_numbers<[1], [0], [0], [1], [0, 0, 1, 1], [], []>} : vector<16x784xbf16>, vector<784x512xbf16>, vector<16x512xf32> -> vector<16x512xf32>
    %c0_3 = arith.constant 0 : index
    %c0_4 = arith.constant 0 : index
    %4 = vector.load %arg3[%c0_3, %c0_4] : memref<1x512xf32, #tpu.memory_space<vmem>>, vector<1x512xf32>
    %5 = vector.broadcast %4 : vector<1x512xf32> to vector<16x512xf32>
    %6 = arith.addf %3, %5 : vector<16x512xf32>
    %cst_5 = arith.constant 0.000000e+00 : f32
    %7 = vector.broadcast %cst_5 : f32 to vector<16x512xf32>
    %8 = arith.cmpf oge, %6, %7 : vector<16x512xf32>
    %cst_6 = arith.constant 2.000000e-01 : f32
    %9 = vector.broadcast %cst_6 : f32 to vector<16x512xf32>
    %10 = arith.mulf %9, %6 : vector<16x512xf32>
    %11 = arith.select %8, %6, %10 : vector<16x512xi1>, vector<16x512xf32>
    %12 = arith.truncf %11 : vector<16x512xf32> to vector<16x512xbf16>
    %c0_7 = arith.constant 0 : index
    %c0_8 = arith.constant 0 : index
    %13 = vector.load %arg4[%c0_7, %c0_8] : memref<512x256xbf16, #tpu.memory_space<vmem>>, vector<512x256xbf16>
    %cst_9 = arith.constant dense<0.000000e+00> : vector<16x256xf32>
    %14 = tpu.matmul %12, %13, %cst_9 {dimension_numbers = #tpu.dot_dimension_numbers<[1], [0], [0], [1], [0, 0, 1, 1], [], []>} : vector<16x512xbf16>, vector<512x256xbf16>, vector<16x256xf32> -> vector<16x256xf32>
    %c0_10 = arith.constant 0 : index
    %c0_11 = arith.constant 0 : index
    %15 = vector.load %arg5[%c0_10, %c0_11] : memref<1x256xf32, #tpu.memory_space<vmem>>, vector<1x256xf32>
    %16 = vector.broadcast %15 : vector<1x256xf32> to vector<16x256xf32>
    %17 = arith.addf %14, %16 : vector<16x256xf32>
    %cst_12 = arith.constant 0.000000e+00 : f32
    %18 = vector.broadcast %cst_12 : f32 to vector<16x256xf32>
    %19 = arith.cmpf oge, %17, %18 : vector<16x256xf32>
    %cst_13 = arith.constant 2.000000e-01 : f32
    %20 = vector.broadcast %cst_13 : f32 to vector<16x256xf32>
    %21 = arith.mulf %20, %17 : vector<16x256xf32>
    %22 = arith.select %19, %17, %21 : vector<16x256xi1>, vector<16x256xf32>
    %23 = arith.truncf %22 : vector<16x256xf32> to vector<16x256xbf16>
    %c0_14 = arith.constant 0 : index
    %c0_15 = arith.constant 0 : index
    %24 = vector.load %arg6[%c0_14, %c0_15] : memref<256x128xbf16, #tpu.memory_space<vmem>>, vector<256x128xbf16>
    %cst_16 = arith.constant dense<0.000000e+00> : vector<16x128xf32>
    %25 = tpu.matmul %23, %24, %cst_16 {dimension_numbers = #tpu.dot_dimension_numbers<[1], [0], [0], [1], [0, 0, 1, 1], [], []>} : vector<16x256xbf16>, vector<256x128xbf16>, vector<16x128xf32> -> vector<16x128xf32>
    %c0_17 = arith.constant 0 : index
    %c0_18 = arith.constant 0 : index
    %26 = vector.load %arg7[%c0_17, %c0_18] : memref<1x128xf32, #tpu.memory_space<vmem>>, vector<1x128xf32>
    %27 = vector.broadcast %26 : vector<1x128xf32> to vector<16x128xf32>
    %28 = arith.addf %25, %27 : vector<16x128xf32>
    %29 = arith.truncf %28 : vector<16x128xf32> to vector<16x128xbf16>
    %c0_19 = arith.constant 0 : index
    %c0_20 = arith.constant 0 : index
    %30 = vector.load %arg8[%c0_19, %c0_20] : memref<16x128xbf16, #tpu.memory_space<vmem>>, vector<16x128xbf16>
    tpu.vector_store %arg8[%c0_19, %c0_20], %29 {strides = array<i32>} : memref<16x128xbf16, #tpu.memory_space<vmem>>, vector<16x128xbf16>,
    return
  }
  func.func @transform_0(%arg0: i32) -> (i32, i32) {
    %c0_i32 = arith.constant 0 : i32
    %c0_i32_0 = arith.constant 0 : i32
    return %arg0, %c0_i32 : i32, i32
  }
  func.func @transform_1(%arg0: i32) -> (i32, i32) {
    %c0_i32 = arith.constant 0 : i32
    %c0_i32_0 = arith.constant 0 : i32
    %c0_i32_1 = arith.constant 0 : i32
    return %c0_i32, %c0_i32_0 : i32, i32
  }
  func.func @transform_2(%arg0: i32) -> (i32, i32) {
    %c0_i32 = arith.constant 0 : i32
    %c0_i32_0 = arith.constant 0 : i32
    %c0_i32_1 = arith.constant 0 : i32
    return %c0_i32, %c0_i32_0 : i32, i32
  }
  func.func @transform_3(%arg0: i32) -> (i32, i32) {
    %c0_i32 = arith.constant 0 : i32
    %c0_i32_0 = arith.constant 0 : i32
    %c0_i32_1 = arith.constant 0 : i32
    return %c0_i32, %c0_i32_0 : i32, i32
  }
  func.func @transform_4(%arg0: i32) -> (i32, i32) {
    %c0_i32 = arith.constant 0 : i32
    %c0_i32_0 = arith.constant 0 : i32
    %c0_i32_1 = arith.constant 0 : i32
    return %c0_i32, %c0_i32_0 : i32, i32
  }
  func.func @transform_5(%arg0: i32) -> (i32, i32) {
    %c0_i32 = arith.constant 0 : i32
    %c0_i32_0 = arith.constant 0 : i32
    %c0_i32_1 = arith.constant 0 : i32
    return %c0_i32, %c0_i32_0 : i32, i32
  }
  func.func @transform_6(%arg0: i32) -> (i32, i32) {
    %c0_i32 = arith.constant 0 : i32
    %c0_i32_0 = arith.constant 0 : i32
    %c0_i32_1 = arith.constant 0 : i32
    return %c0_i32, %c0_i32_0 : i32, i32
  }
  func.func @transform_7(%arg0: i32) -> (i32, i32) {
    %c0_i32 = arith.constant 0 : i32
    %c0_i32_0 = arith.constant 0 : i32
    return %arg0, %c0_i32 : i32, i32
  }
}

</mosaic_0001>

<bundles_post_ra>
// kernel: tpu_custom_call.1
= control target key start
LH: loop header
LB: loop body
LE: loop exit
PB: predicated region body
PF: predicated region fallthrough
CT: control target
= control target key end

     0   :  { %12 = vsyncpa [#allocation3], 0  ;;  %s3452_s0 = inlined_call_operand.hbm [shape: f32[16,784], index: 0, kind: input, shape index: {}]   ;;  %s3453_s1 = inlined_call_operand.hbm [shape: bf16[784,512], index: 1, kind: input, shape index: {}]   ;;  %s3454_s2 = inlined_call_operand.vmem [shape: f32[1,512], index: 2, kind: input, shape index: {}]   ;;  %s3455_s3 = inlined_call_operand.hbm [shape: bf16[512,256], index: 3, kind: input, shape index: {}]   ;;  %s3456_s4 = inlined_call_operand.vmem [shape: f32[1,256], index: 4, kind: input, shape index: {}]   ;;  %s3457_s5 = inlined_call_operand.hbm [shape: bf16[256,128], index: 5, kind: input, shape index: {}]   ;;  %s3458_s6 = inlined_call_operand.vmem [shape: f32[1,128], index: 6, kind: input, shape index: {}]   ;;  %s3459_s7 = inlined_call_operand.hbm [shape: bf16[16,128], index: 7, kind: output, shape index: {}]  }
   0x1   :  { %13 = vsyncpa [#allocation6], 0 }
   0x2   :  { %14 = vsyncpa [#allocation9], 0 }
   0x3   :  { %15 = vsyncpa [#allocation4], 0  ;;  %s3267_s24 = smov [#allocation5]   ;;  %s3149_s28 = scalar_lea.hbm %s3453_s1, 25088 }
   0x4   :  { %s33_s25 = sshll.u32 %s3267_s24, 4  ;;  %p3150_p0 = scmp.ne.s32.totalorder %s3453_s1, %s3149_s28  ;;  %s34_s25 = int_to_ptr.vmem [resolvable:$true] %s33_s25 }
   0x5   :  { %p3153_p1 = scmp.lt.u32.totalorder %s3149_s28, %s3453_s1 }
   0x7   :  { %p3155_p2 = pnand %p3153_p1, %p3150_p0 }
   0x9   :  { %3158 = shalt.err (!%p3155_p2)
}
   0xa   :  { %s3159_s10 = scalar_lea.vmem %s34_s25, 25088  ;;  %p3164_p4 = scmp.lt.s32.totalorder %s34_s25, %s34_s25 }
   0xb   :  { %p3160_p3 = scmp.ne.s32.totalorder %s34_s25, %s3159_s10  ;;  %p3165_p5 = scmp.lt.s32.totalorder %s3159_s10, %s3159_s10 }
   0xd   :  { %p3166_p6 = por %p3165_p5, %p3164_p4 }
   0xf   :  { %p3167_p7 = pnand %p3166_p6, %p3160_p3 }
  0x11   :  { %3170 = shalt.err (!%p3167_p7)
}
  0x12   :  { %s3268_s11 = smov 256   ;;  %s3269_s12 = smov 16  }
  0x13   :  { %39 = dma.hbm_to_vmem [thread:$0]  %s3453_s1, 25088, %s34_s25, [#allocation6], %s3268_s11, %s3268_s11, %s3269_s12  }
  0x14   :  { %s3270_s15 = smov [#allocation2]   ;;  %s3171_s19 = scalar_lea.hbm %s3452_s0, 1792 }
  0x15   :  { %s21_s16 = sshll.u32 %s3270_s15, 4  ;;  %p3172_p8 = scmp.ne.s32.totalorder %s3452_s0, %s3171_s19  ;;  %s22_s16 = int_to_ptr.vmem [resolvable:$true] %s21_s16 }
  0x16   :  { %p3175_p9 = scmp.lt.u32.totalorder %s3171_s19, %s3452_s0 }
  0x18   :  { %p3177_p10 = pnand %p3175_p9, %p3172_p8 }
  0x1a   :  { %3180 = shalt.err (!%p3177_p10)
}
  0x1b   :  { %s3181_s24 = scalar_lea.vmem %s22_s16, 1792  ;;  %p3186_p12 = scmp.lt.s32.totalorder %s22_s16, %s22_s16 }
  0x1c   :  { %p3182_p11 = scmp.ne.s32.totalorder %s22_s16, %s3181_s24  ;;  %p3187_p13 = scmp.lt.s32.totalorder %s3181_s24, %s3181_s24 }
  0x1e   :  { %p3188_p0 = por %p3187_p13, %p3186_p12 }
  0x20   :  { %p3189_p1 = pnand %p3188_p0, %p3182_p11 }
  0x22   :  { %3192 = shalt.err (!%p3189_p1)
}
  0x23   :  { %s3271_s1 = smov 896   ;;  %s3272_s25 = smov 56  }
  0x24   :  { %27 = dma.hbm_to_vmem [thread:$0]  %s3452_s0, 1792, %s22_s16, [#allocation3], %s3271_s1, %s3271_s1, %s3272_s25  }
  0x25   :  { %s3273_s28 = smov [#allocation7]   ;;  %s3193_s9 = scalar_lea.hbm %s3455_s3, 8192 }
  0x26   :  { %s47_s29 = sshll.u32 %s3273_s28, 4  ;;  %p3194_p2 = scmp.ne.s32.totalorder %s3455_s3, %s3193_s9  ;;  %s48_s29 = int_to_ptr.vmem [resolvable:$true] %s47_s29 }
  0x27   :  { %p3197_p3 = scmp.lt.u32.totalorder %s3193_s9, %s3455_s3 }
  0x29   :  { %p3199_p4 = pnand %p3197_p3, %p3194_p2 }
  0x2b   :  { %3202 = shalt.err (!%p3199_p4)
}
  0x2c   :  { %s3203_s14 = scalar_lea.vmem %s48_s29, 8192  ;;  %p3208_p6 = scmp.lt.s32.totalorder %s48_s29, %s48_s29 }
  0x2d   :  { %p3204_p5 = scmp.ne.s32.totalorder %s48_s29, %s3203_s14  ;;  %p3209_p7 = scmp.lt.s32.totalorder %s3203_s14, %s3203_s14 }
  0x2f   :  { %p3210_p8 = por %p3209_p7, %p3208_p6 }
  0x31   :  { %p3211_p9 = pnand %p3210_p8, %p3204_p5 }
  0x33   :  { %3214 = shalt.err (!%p3211_p9)
}
  0x34   :  { %s3274_s0 = smov 128   ;;  %s3275_s15 = smov 8  }
  0x35   :  { %53 = dma.hbm_to_vmem [thread:$0]  %s3455_s3, 8192, %s48_s29, [#allocation6], %s3274_s0, %s3274_s0, %s3275_s15  }
  0x36   :  { %s3276_s18 = smov [#allocation8]   ;;  %s3215_s22 = scalar_lea.hbm %s3457_s5, 2048 }
  0x37   :  { %s61_s19 = sshll.u32 %s3276_s18, 4  ;;  %p3216_p10 = scmp.ne.s32.totalorder %s3457_s5, %s3215_s22  ;;  %s62_s19 = int_to_ptr.vmem [resolvable:$true] %s61_s19 }
  0x38   :  { %p3219_p11 = scmp.lt.u32.totalorder %s3215_s22, %s3457_s5 }
  0x3a   :  { %p3221_p12 = pnand %p3219_p11, %p3216_p10 }
  0x3c   :  { %3224 = shalt.err (!%p3221_p12)
}
  0x3d   :  { %s3225_s26 = scalar_lea.vmem %s62_s19, 2048  ;;  %p3230_p0 = scmp.lt.s32.totalorder %s62_s19, %s62_s19 }
  0x3e   :  { %p3226_p13 = scmp.ne.s32.totalorder %s62_s19, %s3225_s26  ;;  %p3231_p1 = scmp.lt.s32.totalorder %s3225_s26, %s3225_s26 }
  0x40   :  { %p3232_p2 = por %p3231_p1, %p3230_p0 }
  0x42   :  { %p3233_p3 = pnand %p3232_p2, %p3226_p13 }
  0x44   :  { %3236 = shalt.err (!%p3233_p3)
}
  0x45   :  { %s3277_s3 = smov 64   ;;  %s3278_s27 = smov 4  }
  0x46   :  { %67 = dma.hbm_to_vmem [thread:$0]  %s3457_s5, 2048, %s62_s19, [#allocation9], %s3277_s3, %s3277_s3, %s3278_s27  }
  0x47   :  { %3259 = dma.done.wait [#allocation3], 1792  }
  0x48   :  { %3260 = vsyncadd [#allocation3], 4294965504 }
  0x49   :  { %3261 = dma.done.wait [#allocation6], 33280  }
  0x4a   :  { %3262 = vsyncadd [#allocation6], 4294934016 }
  0x4b   :  { %3263 = dma.done.wait [#allocation9], 2048  }
  0x4c   :  { %3264 = vsyncadd [#allocation9], 4294965248  ;;  %v2743_v0 = vld [vmem:[#allocation5 + $0x4] ss:$16 sps:$4 sm:$0xff]   ;;  %v2747_v2 = vld [vmem:[#allocation5] ss:$16 sps:$4 sm:$0xff]  }
  0x4d   :  { %v2745_v1 = vld [vmem:[#allocation5 + $0x204] ss:$16 sps:$4 sm:$0xff]   ;;  %1306 = vmatprep.subr.bf16.mxu1 %v2743_v0  ;;  %v2748_v3 = vld [vmem:[#allocation5 + $0x200] ss:$16 sps:$4 sm:$0xff]   ;;  %v84_v46 = vld [vmem:[#allocation2 + $0x8] sm:$0xff]  ;;  %vm1302_vm0 = vcmask 130048  }
  0x4e   :  { %1349 = vmatprep.subr.bf16.mxu0 %v2745_v1  ;;  %v2749_v4 = vld [vmem:[#allocation5 + $0x24] ss:$16 sps:$4 sm:$0xff]   ;;  %1307 = vmatpush1.bf16.msra.mxu1 %v2747_v2  ;;  %v2753_v6 = vld [vmem:[#allocation5 + $0x20] ss:$16 sps:$4 sm:$0xff]   ;;  %v86_v51 = vld [vmem:[#allocation2 + $0x18] sm:$0xff]  ;;  %s3280_s10 = smov [#allocation10]  }
  0x4f   :  { %1350 = vmatpush1.bf16.msra.mxu0 %v2748_v3  ;;  %v2751_v5 = vld [vmem:[#allocation5 + $0x224] ss:$16 sps:$4 sm:$0xff]   ;;  %1308 = vmatprep.subr.bf16.mxu1 %v2749_v4  ;;  %v2754_v7 = vld [vmem:[#allocation5 + $0x220] ss:$16 sps:$4 sm:$0xff]   ;;  %s2365_s11 = sshll.u32 %s3280_s10, 4  ;;  %s2366_s11 = int_to_ptr.vmem [resolvable:$true] %s2365_s11 }
  0x50   :  { %1351 = vmatprep.subr.bf16.mxu0 %v2751_v5  ;;  %v2755_v8 = vld [vmem:[#allocation5 + $0x44] ss:$16 sps:$4 sm:$0xff]   ;;  %v2759_v10 = vld [vmem:[#allocation5 + $0x40] ss:$16 sps:$4 sm:$0xff]   ;;  %s3237_s12 = scalar_lea.vmem %s2366_s11, 128  ;;  %p3242_p5 = scmp.lt.s32.totalorder %s2366_s11, %s2366_s11 }
  0x51   :  { %v2757_v9 = vld [vmem:[#allocation5 + $0x244] ss:$16 sps:$4 sm:$0xff]   ;;  %v2760_v11 = vld [vmem:[#allocation5 + $0x240] ss:$16 sps:$4 sm:$0xff]   ;;  %p3238_p4 = scmp.ne.s32.totalorder %s2366_s11, %s3237_s12  ;;  %p3243_p6 = scmp.lt.s32.totalorder %s3237_s12, %s3237_s12 }
  0x52   :  { %1309 = vmatpush1.bf16.msra.mxu1 %v2753_v6  ;;  %v2761_v12 = vld [vmem:[#allocation5 + $0x64] ss:$16 sps:$4 sm:$0xff]   ;;  %v2765_v14 = vld [vmem:[#allocation5 + $0x60] ss:$16 sps:$4 sm:$0xff]  }
  0x53   :  { %1352 = vmatpush1.bf16.msra.mxu0 %v2754_v7  ;;  %1310 = vmatprep.subr.bf16.mxu1 %v2755_v8  ;;  %v2763_v13 = vld [vmem:[#allocation5 + $0x264] ss:$16 sps:$4 sm:$0xff]   ;;  %v2766_v15 = vld [vmem:[#allocation5 + $0x260] ss:$16 sps:$4 sm:$0xff]   ;;  %v90_v7 = vld [vmem:[#allocation2 + $0x38] sm:$0xff]  ;;  %p3244_p7 = por %p3243_p6, %p3242_p5 }
  0x54   :  { %1353 = vmatprep.subr.bf16.mxu0 %v2757_v9  ;;  %v2767_v16 = vld [vmem:[#allocation5 + $0x84] ss:$16 sps:$4 sm:$0xff]   ;;  %v2771_v18 = vld [vmem:[#allocation5 + $0x80] ss:$16 sps:$4 sm:$0xff]  }
  0x55   :  { %v2769_v17 = vld [vmem:[#allocation5 + $0x284] ss:$16 sps:$4 sm:$0xff]   ;;  %v2772_v19 = vld [vmem:[#allocation5 + $0x280] ss:$16 sps:$4 sm:$0xff]   ;;  %p3245_p8 = pnand %p3244_p7, %p3238_p4 }
  0x56   :  { %1311 = vmatpush1.bf16.msra.mxu1 %v2759_v10  ;;  %v2773_v20 = vld [vmem:[#allocation5 + $0xa4] ss:$16 sps:$4 sm:$0xff]   ;;  %v2777_v22 = vld [vmem:[#allocation5 + $0xa0] ss:$16 sps:$4 sm:$0xff]   ;;  %v92_v10 = vld [vmem:[#allocation2 + $0x48] sm:$0xff] }
  0x57   :  { %1354 = vmatpush1.bf16.msra.mxu0 %v2760_v11  ;;  %1312 = vmatprep.subr.bf16.mxu1 %v2761_v12  ;;  %v2775_v21 = vld [vmem:[#allocation5 + $0x2a4] ss:$16 sps:$4 sm:$0xff]   ;;  %v2778_v23 = vld [vmem:[#allocation5 + $0x2a0] ss:$16 sps:$4 sm:$0xff]   ;;  %v2844_v11 = vld [vmem:[#allocation5 + $0xc] ss:$16 sps:$4 sm:$0xff]  }
  0x58   :  { %1355 = vmatprep.subr.bf16.mxu0 %v2763_v13  ;;  %v2779_v24 = vld [vmem:[#allocation5 + $0xc4] ss:$16 sps:$4 sm:$0xff]   ;;  %v2783_v26 = vld [vmem:[#allocation5 + $0xc0] ss:$16 sps:$4 sm:$0xff]  }
  0x59   :  { %v2781_v25 = vld [vmem:[#allocation5 + $0x2c4] ss:$16 sps:$4 sm:$0xff]   ;;  %v2784_v27 = vld [vmem:[#allocation5 + $0x2c0] ss:$16 sps:$4 sm:$0xff]  }
  0x5a   :  { %1313 = vmatpush1.bf16.msra.mxu1 %v2765_v14  ;;  %v2785_v28 = vld [vmem:[#allocation5 + $0xe4] ss:$16 sps:$4 sm:$0xff]   ;;  %v2789_v30 = vld [vmem:[#allocation5 + $0xe0] ss:$16 sps:$4 sm:$0xff]   ;;  %v2842_v14 = vld [vmem:[#allocation5 + $0x8] ss:$16 sps:$4 sm:$0xff]  }
  0x5b   :  { %1356 = vmatpush1.bf16.msra.mxu0 %v2766_v15  ;;  %1314 = vmatprep.subr.bf16.mxu1 %v2767_v16  ;;  %v2787_v29 = vld [vmem:[#allocation5 + $0x2e4] ss:$16 sps:$4 sm:$0xff]   ;;  %v2790_v31 = vld [vmem:[#allocation5 + $0x2e0] ss:$16 sps:$4 sm:$0xff]  }
  0x5c   :  { %1357 = vmatprep.subr.bf16.mxu0 %v2769_v17  ;;  %v2791_v32 = vld [vmem:[#allocation5 + $0x104] ss:$16 sps:$4 sm:$0xff]   ;;  %v2795_v34 = vld [vmem:[#allocation5 + $0x100] ss:$16 sps:$4 sm:$0xff]   ;;  %v2850_v17 = vld [vmem:[#allocation5 + $0x2c] ss:$16 sps:$4 sm:$0xff]  }
  0x5d   :  { %v2793_v33 = vld [vmem:[#allocation5 + $0x304] ss:$16 sps:$4 sm:$0xff]   ;;  %v2796_v35 = vld [vmem:[#allocation5 + $0x300] ss:$16 sps:$4 sm:$0xff]  }
  0x5e   :  { %1315 = vmatpush1.bf16.msra.mxu1 %v2771_v18  ;;  %v2797_v36 = vld [vmem:[#allocation5 + $0x124] ss:$16 sps:$4 sm:$0xff]   ;;  %v2801_v38 = vld [vmem:[#allocation5 + $0x120] ss:$16 sps:$4 sm:$0xff]  }
  0x5f   :  { %1358 = vmatpush1.bf16.msra.mxu0 %v2772_v19  ;;  %1316 = vmatprep.subr.bf16.mxu1 %v2773_v20  ;;  %v2799_v37 = vld [vmem:[#allocation5 + $0x324] ss:$16 sps:$4 sm:$0xff]   ;;  %v2802_v39 = vld [vmem:[#allocation5 + $0x320] ss:$16 sps:$4 sm:$0xff]   ;;  %v2848_v19 = vld [vmem:[#allocation5 + $0x28] ss:$16 sps:$4 sm:$0xff]  }
  0x60   :  { %1359 = vmatprep.subr.bf16.mxu0 %v2775_v21  ;;  %v2803_v40 = vld [vmem:[#allocation5 + $0x144] ss:$16 sps:$4 sm:$0xff]   ;;  %v2807_v42 = vld [vmem:[#allocation5 + $0x140] ss:$16 sps:$4 sm:$0xff]   ;;  %v2856_v21 = vld [vmem:[#allocation5 + $0x4c] ss:$16 sps:$4 sm:$0xff]  }
  0x61   :  { %v2805_v41 = vld [vmem:[#allocation5 + $0x344] ss:$16 sps:$4 sm:$0xff]   ;;  %v2808_v43 = vld [vmem:[#allocation5 + $0x340] ss:$16 sps:$4 sm:$0xff]  }
  0x62   :  { %1317 = vmatpush1.bf16.msra.mxu1 %v2777_v22  ;;  %v2809_v44 = vld [vmem:[#allocation5 + $0x164] ss:$16 sps:$4 sm:$0xff]   ;;  %v2813_v47 = vld [vmem:[#allocation5 + $0x160] ss:$16 sps:$4 sm:$0xff]  }
  0x63   :  { %1360 = vmatpush1.bf16.msra.mxu0 %v2778_v23  ;;  %1318 = vmatprep.subr.bf16.mxu1 %v2779_v24  ;;  %v2811_v45 = vld [vmem:[#allocation5 + $0x364] ss:$16 sps:$4 sm:$0xff]   ;;  %v2814_v48 = vld [vmem:[#allocation5 + $0x360] ss:$16 sps:$4 sm:$0xff]   ;;  %v2854_v23 = vld [vmem:[#allocation5 + $0x48] ss:$16 sps:$4 sm:$0xff]  }
  0x64   :  { %1361 = vmatprep.subr.bf16.mxu0 %v2781_v25  ;;  %v91_v49 = vld [vmem:[#allocation2 + $0x40] sm:$0xff]  ;;  %v93_v52 = vld [vmem:[#allocation2 + $0x50] sm:$0xff]  ;;  %v2862_v25 = vld [vmem:[#allocation5 + $0x6c] ss:$16 sps:$4 sm:$0xff]  }
  0x65   :  { %v3372_v50 = vpack.c.bf16 %v91_v49, %v84_v46  ;;  %v2815_v53 = vld [vmem:[#allocation5 + $0x184] ss:$16 sps:$4 sm:$0xff]   ;;  %v3374_v55 = vpack.c.bf16 %v93_v52, %v86_v51  ;;  %v2819_v56 = vld [vmem:[#allocation5 + $0x180] ss:$16 sps:$4 sm:$0xff]   ;;  %v2884_v46 = vld [vmem:[#allocation5 + $0xe8] ss:$16 sps:$4 sm:$0xff]  }
  0x66   :  { %1319 = vmatpush1.bf16.msra.mxu1 %v2783_v26  ;;  %v2817_v54 = vld [vmem:[#allocation5 + $0x384] ss:$16 sps:$4 sm:$0xff]   ;;  %v2820_v57 = vld [vmem:[#allocation5 + $0x380] ss:$16 sps:$4 sm:$0xff]   ;;  %v2898_v52 = vld [vmem:[#allocation5 + $0x12c] ss:$16 sps:$4 sm:$0xff]  }
  0x67   :  { %1362 = vmatpush1.bf16.msra.mxu0 %v2784_v27  ;;  %1320 = vmatprep.subr.bf16.mxu1 %v2785_v28  ;;  %v2821_v58 = vld [vmem:[#allocation5 + $0x1a4] ss:$16 sps:$4 sm:$0xff]   ;;  %v2825_v60 = vld [vmem:[#allocation5 + $0x1a0] ss:$16 sps:$4 sm:$0xff]   ;;  %v2860_v27 = vld [vmem:[#allocation5 + $0x68] ss:$16 sps:$4 sm:$0xff]  }
  0x68   :  { %1363 = vmatprep.subr.bf16.mxu0 %v2787_v29  ;;  %1338 = vmatprep.mubr.bf16.mxu1 %v3372_v50  ;;  %v2823_v59 = vld [vmem:[#allocation5 + $0x3a4] ss:$16 sps:$4 sm:$0xff]   ;;  %v2826_v61 = vld [vmem:[#allocation5 + $0x3a0] ss:$16 sps:$4 sm:$0xff]   ;;  %v2868_v29 = vld [vmem:[#allocation5 + $0x8c] ss:$16 sps:$4 sm:$0xff]  }
  0x69   :  { %1381 = vmatprep.mubr.bf16.mxu0 %v3374_v55  ;;  %v2827_v62 = vld [vmem:[#allocation5 + $0x1c4] ss:$16 sps:$4 sm:$0xff]   ;;  %v2831_v0 = vld [vmem:[#allocation5 + $0x1c0] ss:$16 sps:$4 sm:$0xff]  }
  0x6a   :  { %1321 = vmatpush1.bf16.msra.mxu1 %v2789_v30  ;;  %v2829_v63 = vld [vmem:[#allocation5 + $0x3c4] ss:$16 sps:$4 sm:$0xff]   ;;  %v2832_v1 = vld [vmem:[#allocation5 + $0x3c0] ss:$16 sps:$4 sm:$0xff]  }
  0x6b   :  { %1364 = vmatpush1.bf16.msra.mxu0 %v2790_v31  ;;  %1322 = vmatprep.subr.bf16.mxu1 %v2791_v32  ;;  %v2833_v2 = vld [vmem:[#allocation5 + $0x1e4] ss:$16 sps:$4 sm:$0xff]   ;;  %v2837_v4 = vld [vmem:[#allocation5 + $0x1e0] ss:$16 sps:$4 sm:$0xff]   ;;  %v2866_v31 = vld [vmem:[#allocation5 + $0x88] ss:$16 sps:$4 sm:$0xff]  }
  0x6c   :  { %1365 = vmatprep.subr.bf16.mxu0 %v2793_v33  ;;  %v2835_v3 = vld [vmem:[#allocation5 + $0x3e4] ss:$16 sps:$4 sm:$0xff]   ;;  %v2838_v5 = vld [vmem:[#allocation5 + $0x3e0] ss:$16 sps:$4 sm:$0xff]   ;;  %v2874_v33 = vld [vmem:[#allocation5 + $0xac] ss:$16 sps:$4 sm:$0xff]  }
  0x6d   :  { %v83_v6 = vld [vmem:[#allocation2] sm:$0xff]  ;;  %v85_v9 = vld [vmem:[#allocation2 + $0x10] sm:$0xff] }
  0x6e   :  { %1323 = vmatpush1.bf16.msra.mxu1 %v2795_v34  ;;  %v2841_v8 = vld [vmem:[#allocation5 + $0x404] ss:$16 sps:$4 sm:$0xff]   ;;  %v3378_v12 = vpack.c.bf16 %v90_v7, %v83_v6  ;;  %v2839_v13 = vld [vmem:[#allocation5 + $0x400] ss:$16 sps:$4 sm:$0xff]   ;;  %v3380_v15 = vpack.c.bf16 %v92_v10, %v85_v9  ;;  %v2920_v7 = vld [vmem:[#allocation5 + $0x1a8] ss:$16 sps:$4 sm:$0xff]  }
  0x6f   :  { %1366 = vmatpush1.bf16.msra.mxu0 %v2796_v35  ;;  %1324 = vmatprep.subr.bf16.mxu1 %v2797_v36  ;;  %v2847_v16 = vld [vmem:[#allocation5 + $0x424] ss:$16 sps:$4 sm:$0xff]   ;;  %v2845_v18 = vld [vmem:[#allocation5 + $0x420] ss:$16 sps:$4 sm:$0xff]   ;;  %v2872_v35 = vld [vmem:[#allocation5 + $0xa8] ss:$16 sps:$4 sm:$0xff]  }
  0x70   :  { %1367 = vmatprep.subr.bf16.mxu0 %v2799_v37  ;;  %v2853_v20 = vld [vmem:[#allocation5 + $0x444] ss:$16 sps:$4 sm:$0xff]   ;;  %v2851_v22 = vld [vmem:[#allocation5 + $0x440] ss:$16 sps:$4 sm:$0xff]   ;;  %v2880_v37 = vld [vmem:[#allocation5 + $0xcc] ss:$16 sps:$4 sm:$0xff]  }
  0x71   :  { %v2859_v24 = vld [vmem:[#allocation5 + $0x464] ss:$16 sps:$4 sm:$0xff]   ;;  %v2857_v26 = vld [vmem:[#allocation5 + $0x460] ss:$16 sps:$4 sm:$0xff]   ;;  %v2928_v9 = vld [vmem:[#allocation5 + $0x1cc] ss:$16 sps:$4 sm:$0xff]  }
  0x72   :  { %1325 = vmatpush1.bf16.msra.mxu1 %v2801_v38  ;;  %v2865_v28 = vld [vmem:[#allocation5 + $0x484] ss:$16 sps:$4 sm:$0xff]   ;;  %v2863_v30 = vld [vmem:[#allocation5 + $0x480] ss:$16 sps:$4 sm:$0xff]  }
  0x73   :  { %1368 = vmatpush1.bf16.msra.mxu0 %v2802_v39  ;;  %1326 = vmatprep.subr.bf16.mxu1 %v2803_v40  ;;  %v2871_v32 = vld [vmem:[#allocation5 + $0x4a4] ss:$16 sps:$4 sm:$0xff]   ;;  %v2869_v34 = vld [vmem:[#allocation5 + $0x4a0] ss:$16 sps:$4 sm:$0xff]   ;;  %v2878_v39 = vld [vmem:[#allocation5 + $0xc8] ss:$16 sps:$4 sm:$0xff]  }
  0x74   :  { %1369 = vmatprep.subr.bf16.mxu0 %v2805_v41  ;;  %v2877_v36 = vld [vmem:[#allocation5 + $0x4c4] ss:$16 sps:$4 sm:$0xff]   ;;  %v2875_v38 = vld [vmem:[#allocation5 + $0x4c0] ss:$16 sps:$4 sm:$0xff]   ;;  %v88_v41 = vld [vmem:[#allocation2 + $0x28] sm:$0xff] }
  0x75   :  { %v2883_v40 = vld [vmem:[#allocation5 + $0x4e4] ss:$16 sps:$4 sm:$0xff]   ;;  %v2887_v49 = vld [vmem:[#allocation5 + $0x500] ss:$16 sps:$4 sm:$0xff]  }
  0x76   :  { %1327 = vmatpush1.bf16.msra.mxu1 %v2807_v42  ;;  %v95_v42 = vld [vmem:[#allocation2 + $0x60] sm:$0xff] }
  0x77   :  { %1370 = vmatpush1.bf16.msra.mxu0 %v2808_v43  ;;  %1328 = vmatprep.subr.bf16.mxu1 %v2809_v44  ;;  %v2886_v43 = vld [vmem:[#allocation5 + $0xec] ss:$16 sps:$4 sm:$0xff]   ;;  %v3385_v44 = vpack.c.bf16 %v95_v42, %v88_v41  ;;  %v2895_v51 = vld [vmem:[#allocation5 + $0x524] ss:$16 sps:$4 sm:$0xff]   ;;  %v2917_v6 = vld [vmem:[#allocation5 + $0x5a0] ss:$16 sps:$4 sm:$0xff]  }
  0x78   :  { %1371 = vmatprep.subr.bf16.mxu0 %v2811_v45  ;;  %v2881_v45 = vld [vmem:[#allocation5 + $0x4e0] ss:$16 sps:$4 sm:$0xff]   ;;  %v2961_v41 = vld [vmem:[#allocation5 + $0x2ec] ss:$16 sps:$4 sm:$0xff]  }
  0x79   :  { %v2923_v10 = vld [vmem:[#allocation5 + $0x5c0] ss:$16 sps:$4 sm:$0xff]  }
  0x7a   :  { %1329 = vmatpush1.bf16.msra.mxu1 %v2813_v47  ;;  %v2889_v47 = vld [vmem:[#allocation5 + $0x504] ss:$16 sps:$4 sm:$0xff]   ;;  %v3037_v42 = vld [vmem:[#allocation7] ss:$8 sps:$4 sm:$0xff]  }
  0x7b   :  { %1372 = vmatpush1.bf16.msra.mxu0 %v2814_v48  ;;  %1330 = vmatprep.subr.bf16.mxu1 %v2815_v53  ;;  %v2892_v48 = vld [vmem:[#allocation5 + $0x10c] ss:$16 sps:$4 sm:$0xff]   ;;  %v2893_v53 = vld [vmem:[#allocation5 + $0x520] ss:$16 sps:$4 sm:$0xff]  }
  0x7c   :  { %1373 = vmatprep.subr.bf16.mxu0 %v2817_v54  ;;  %v2896_v54 = vld [vmem:[#allocation5 + $0x128] ss:$16 sps:$4 sm:$0xff]  }
  0x7e   :  { %1331 = vmatpush1.bf16.msra.mxu1 %v2819_v56  ;;  %v2901_v56 = vld [vmem:[#allocation5 + $0x544] ss:$16 sps:$4 sm:$0xff]  }
  0x7f   :  { %1374 = vmatpush1.bf16.msra.mxu0 %v2820_v57  ;;  %1332 = vmatprep.subr.bf16.mxu1 %v2821_v58  ;;  %v2904_v57 = vld [vmem:[#allocation5 + $0x14c] ss:$16 sps:$4 sm:$0xff]   ;;  %v2899_v58 = vld [vmem:[#allocation5 + $0x540] ss:$16 sps:$4 sm:$0xff]  }
  0x80   :  { %1375 = vmatprep.subr.bf16.mxu0 %v2823_v59  ;;  %v2902_v59 = vld [vmem:[#allocation5 + $0x148] ss:$16 sps:$4 sm:$0xff]  }
  0x82   :  { %1333 = vmatpush1.bf16.msra.mxu1 %v2825_v60  ;;  %v2907_v60 = vld [vmem:[#allocation5 + $0x564] ss:$16 sps:$4 sm:$0xff]  }
  0x83   :  { %1376 = vmatpush1.bf16.msra.mxu0 %v2826_v61  ;;  %1334 = vmatprep.subr.bf16.mxu1 %v2827_v62  ;;  %v2910_v61 = vld [vmem:[#allocation5 + $0x16c] ss:$16 sps:$4 sm:$0xff]   ;;  %v2905_v62 = vld [vmem:[#allocation5 + $0x560] ss:$16 sps:$4 sm:$0xff]  }
  0x84   :  { %1377 = vmatprep.subr.bf16.mxu0 %v2829_v63  ;;  %v2908_v63 = vld [vmem:[#allocation5 + $0x168] ss:$16 sps:$4 sm:$0xff]  }
  0x86   :  { %1335 = vmatpush1.bf16.msra.mxu1 %v2831_v0  ;;  %v2913_v0 = vld [vmem:[#allocation5 + $0x584] ss:$16 sps:$4 sm:$0xff]  }
  0x87   :  { %1378 = vmatpush1.bf16.msra.mxu0 %v2832_v1  ;;  %1336 = vmatprep.subr.bf16.mxu1 %v2833_v2  ;;  %v2916_v1 = vld [vmem:[#allocation5 + $0x18c] ss:$16 sps:$4 sm:$0xff]   ;;  %v2911_v2 = vld [vmem:[#allocation5 + $0x580] ss:$16 sps:$4 sm:$0xff]  }
  0x88   :  { %1379 = vmatprep.subr.bf16.mxu0 %v2835_v3  ;;  %v2914_v3 = vld [vmem:[#allocation5 + $0x188] ss:$16 sps:$4 sm:$0xff]  }
  0x8a   :  { %1337 = vmatpush1.bf16.msra.mxu1 %v2837_v4  ;;  %v2919_v4 = vld [vmem:[#allocation5 + $0x5a4] ss:$16 sps:$4 sm:$0xff]  }
  0x8b   :  { %1380 = vmatpush1.bf16.msra.mxu0 %v2838_v5  ;;  %1478 = vmatprep.subr.bf16.mxu1 %v2844_v11  ;;  %v2922_v5 = vld [vmem:[#allocation5 + $0x1ac] ss:$16 sps:$4 sm:$0xff]   ;;  %v2926_v11 = vld [vmem:[#allocation5 + $0x1c8] ss:$16 sps:$4 sm:$0xff]  }
  0x8c   :  { %1392 = vmatprep.subr.bf16.mxu0 %v2841_v8  ;;  %v2925_v8 = vld [vmem:[#allocation5 + $0x5c4] ss:$16 sps:$4 sm:$0xff]  }
  0x8d   :  { %1339 = vmatmul.mubr.bf16.vlgmr.msra.gmra.mrb[0].mxu1 %v3378_v12 }
  0x8e   :  { %1382 = vmatmul.mubr.bf16.vlgmr.msra.gmra.mrb[0].mxu0 %v3380_v15  ;;  %1479 = vmatpush1.bf16.msra.mxu1 %v2842_v14  ;;  %v2934_v14 = vld [vmem:[#allocation5 + $0x1ec] ss:$16 sps:$4 sm:$0xff]  }
  0x8f   :  { %1393 = vmatpush1.bf16.msra.mxu0 %v2839_v13  ;;  %1480 = vmatprep.subr.bf16.mxu1 %v2850_v17  ;;  %v2931_v13 = vld [vmem:[#allocation5 + $0x5e4] ss:$16 sps:$4 sm:$0xff]   ;;  %v2932_v17 = vld [vmem:[#allocation5 + $0x1e8] ss:$16 sps:$4 sm:$0xff]  }
  0x90   :  { %1394 = vmatprep.subr.bf16.mxu0 %v2847_v16  ;;  %1510 = vmatprep.mubr.bf16.mxu1 %v3372_v50  ;;  %v2890_v50 = vld [vmem:[#allocation5 + $0x108] ss:$16 sps:$4 sm:$0xff]   ;;  %v2929_v16 = vld [vmem:[#allocation5 + $0x5e0] ss:$16 sps:$4 sm:$0xff]  }
  0x91   :  { %1424 = vmatprep.mubr.bf16.mxu0 %v3385_v44 }
  0x92   :  { %1481 = vmatpush1.bf16.msra.mxu1 %v2848_v19  ;;  %v94_v19 = vld [vmem:[#allocation2 + $0x58] sm:$0xff] }
  0x93   :  { %1395 = vmatpush1.bf16.msra.mxu0 %v2845_v18  ;;  %1482 = vmatprep.subr.bf16.mxu1 %v2856_v21  ;;  %v87_v18 = vld [vmem:[#allocation2 + $0x20] sm:$0xff] }
  0x94   :  { %1396 = vmatprep.subr.bf16.mxu0 %v2853_v20  ;;  %v2937_v20 = vld [vmem:[#allocation5 + $0x20c] ss:$16 sps:$4 sm:$0xff]   ;;  %v2943_v21 = vld [vmem:[#allocation5 + $0x604] ss:$16 sps:$4 sm:$0xff]  }
  0x96   :  { %1483 = vmatpush1.bf16.msra.mxu1 %v2854_v23  ;;  %v2935_v23 = vld [vmem:[#allocation5 + $0x208] ss:$16 sps:$4 sm:$0xff]  }
  0x97   :  { %1397 = vmatpush1.bf16.msra.mxu0 %v2851_v22  ;;  %1484 = vmatprep.subr.bf16.mxu1 %v2862_v25  ;;  %v3388_v22 = vpack.c.bf16 %v94_v19, %v87_v18  ;;  %v2940_v25 = vld [vmem:[#allocation5 + $0x22c] ss:$16 sps:$4 sm:$0xff]   ;;  %v3064_v19 = vld [vmem:[#allocation7 + $0x90] ss:$8 sps:$4 sm:$0xff]  }
  0x98   :  { %1398 = vmatprep.subr.bf16.mxu0 %v2859_v24  ;;  %v2941_v24 = vld [vmem:[#allocation5 + $0x600] ss:$16 sps:$4 sm:$0xff]   ;;  %v2988_v18 = vld [vmem:[#allocation5 + $0x40c] ss:$16 sps:$4 sm:$0xff]  }
  0x9a   :  { %1485 = vmatpush1.bf16.msra.mxu1 %v2860_v27  ;;  %v2946_v27 = vld [vmem:[#allocation5 + $0x24c] ss:$16 sps:$4 sm:$0xff]  }
  0x9b   :  { %1399 = vmatpush1.bf16.msra.mxu0 %v2857_v26  ;;  %1486 = vmatprep.subr.bf16.mxu1 %v2868_v29  ;;  %v2938_v26 = vld [vmem:[#allocation5 + $0x228] ss:$16 sps:$4 sm:$0xff]   ;;  %v3033_v29 = vld [vmem:[#allocation5 + $0x60c] ss:$16 sps:$4 sm:$0xff]  }
  0x9c   :  { %1400 = vmatprep.subr.bf16.mxu0 %v2865_v28  ;;  %v3279_v28 = vmov 0  }
  0x9e   :  { %1487 = vmatpush1.bf16.msra.mxu1 %v2866_v31  ;;  %v89_v31 = vld [vmem:[#allocation2 + $0x30] sm:$0xff] }
  0x9f   :  { %1401 = vmatpush1.bf16.msra.mxu0 %v2863_v30  ;;  %1488 = vmatprep.subr.bf16.mxu1 %v2874_v33  ;;  %v2944_v30 = vld [vmem:[#allocation5 + $0x248] ss:$16 sps:$4 sm:$0xff]   ;;  %v2949_v33 = vld [vmem:[#allocation5 + $0x26c] ss:$16 sps:$4 sm:$0xff]  }
  0xa0   :  { %1402 = vmatprep.subr.bf16.mxu0 %v2871_v32  ;;  %v96_v32 = vld [vmem:[#allocation2 + $0x68] sm:$0xff] }
  0xa2   :  { %1489 = vmatpush1.bf16.msra.mxu1 %v2872_v35  ;;  %v3031_v35 = vld [vmem:[#allocation5 + $0x608] ss:$16 sps:$4 sm:$0xff]  }
  0xa3   :  { %1403 = vmatpush1.bf16.msra.mxu0 %v2869_v34  ;;  %1490 = vmatprep.subr.bf16.mxu1 %v2880_v37  ;;  %v2947_v34 = vld [vmem:[#allocation5 + $0x268] ss:$16 sps:$4 sm:$0xff]  }
  0xa4   :  { %1404 = vmatprep.subr.bf16.mxu0 %v2877_v36  ;;  %v2952_v36 = vld [vmem:[#allocation5 + $0x28c] ss:$16 sps:$4 sm:$0xff]   ;;  %v2950_v37 = vld [vmem:[#allocation5 + $0x288] ss:$16 sps:$4 sm:$0xff]  }
  0xa6   :  { %1491 = vmatpush1.bf16.msra.mxu1 %v2878_v39  ;;  %v2958_v39 = vld [vmem:[#allocation5 + $0x2cc] ss:$16 sps:$4 sm:$0xff]  }
  0xa7   :  { %1405 = vmatpush1.bf16.msra.mxu0 %v2875_v38  ;;  %1492 = vmatprep.subr.bf16.mxu1 %v2886_v43  ;;  %v2955_v38 = vld [vmem:[#allocation5 + $0x2ac] ss:$16 sps:$4 sm:$0xff]  }
  0xa8   :  { %1406 = vmatprep.subr.bf16.mxu0 %v2883_v40  ;;  %v2956_v40 = vld [vmem:[#allocation5 + $0x2c8] ss:$16 sps:$4 sm:$0xff]   ;;  %v3039_v43 = vld [vmem:[#allocation7 + $0x4] ss:$8 sps:$4 sm:$0xff]  }
  0xaa   :  { %1493 = vmatpush1.bf16.msra.mxu1 %v2884_v46  ;;  %v2959_v46 = vld [vmem:[#allocation5 + $0x2e8] ss:$16 sps:$4 sm:$0xff]  }
  0xab   :  { %1407 = vmatpush1.bf16.msra.mxu0 %v2881_v45  ;;  %1494 = vmatprep.subr.bf16.mxu1 %v2892_v48  ;;  %v3042_v45 = vld [vmem:[#allocation7 + $0x14] ss:$8 sps:$4 sm:$0xff]   ;;  %v3040_v48 = vld [vmem:[#allocation7 + $0x10] ss:$8 sps:$4 sm:$0xff]  }
  0xac   :  { %1408 = vmatprep.subr.bf16.mxu0 %v2889_v47  ;;  %v2964_v47 = vld [vmem:[#allocation5 + $0x30c] ss:$16 sps:$4 sm:$0xff]  }
  0xae   :  { %1495 = vmatpush1.bf16.msra.mxu1 %v2890_v50  ;;  %v2962_v50 = vld [vmem:[#allocation5 + $0x308] ss:$16 sps:$4 sm:$0xff]  }
  0xaf   :  { %1409 = vmatpush1.bf16.msra.mxu0 %v2887_v49  ;;  %1496 = vmatprep.subr.bf16.mxu1 %v2898_v52  ;;  %v3045_v49 = vld [vmem:[#allocation7 + $0x24] ss:$8 sps:$4 sm:$0xff]   ;;  %v3043_v52 = vld [vmem:[#allocation7 + $0x20] ss:$8 sps:$4 sm:$0xff]  }
  0xb0   :  { %1410 = vmatprep.subr.bf16.mxu0 %v2895_v51  ;;  %v2967_v51 = vld [vmem:[#allocation5 + $0x32c] ss:$16 sps:$4 sm:$0xff]  }
  0xb2   :  { %1497 = vmatpush1.bf16.msra.mxu1 %v2896_v54  ;;  %v3048_v54 = vld [vmem:[#allocation7 + $0x34] ss:$8 sps:$4 sm:$0xff]  }
  0xb3   :  { %1411 = vmatpush1.bf16.msra.mxu0 %v2893_v53  ;;  %1498 = vmatprep.subr.bf16.mxu1 %v2904_v57  ;;  %v2965_v53 = vld [vmem:[#allocation5 + $0x328] ss:$16 sps:$4 sm:$0xff]  }
  0xb4   :  { %1412 = vmatprep.subr.bf16.mxu0 %v2901_v56  ;;  %v2970_v56 = vld [vmem:[#allocation5 + $0x34c] ss:$16 sps:$4 sm:$0xff]   ;;  %v3046_v57 = vld [vmem:[#allocation7 + $0x30] ss:$8 sps:$4 sm:$0xff]  }
  0xb6   :  { %1499 = vmatpush1.bf16.msra.mxu1 %v2902_v59  ;;  %v2968_v59 = vld [vmem:[#allocation5 + $0x348] ss:$16 sps:$4 sm:$0xff]  }
  0xb7   :  { %1413 = vmatpush1.bf16.msra.mxu0 %v2899_v58  ;;  %1500 = vmatprep.subr.bf16.mxu1 %v2910_v61  ;;  %v3051_v58 = vld [vmem:[#allocation7 + $0x44] ss:$8 sps:$4 sm:$0xff]   ;;  %v3049_v61 = vld [vmem:[#allocation7 + $0x40] ss:$8 sps:$4 sm:$0xff]  }
  0xb8   :  { %1414 = vmatprep.subr.bf16.mxu0 %v2907_v60  ;;  %v2973_v60 = vld [vmem:[#allocation5 + $0x36c] ss:$16 sps:$4 sm:$0xff]  }
  0xba   :  { %1501 = vmatpush1.bf16.msra.mxu1 %v2908_v63  ;;  %v2971_v63 = vld [vmem:[#allocation5 + $0x368] ss:$16 sps:$4 sm:$0xff]  }
  0xbb   :  { %1415 = vmatpush1.bf16.msra.mxu0 %v2905_v62  ;;  %1502 = vmatprep.subr.bf16.mxu1 %v2916_v1  ;;  %v3054_v62 = vld [vmem:[#allocation7 + $0x54] ss:$8 sps:$4 sm:$0xff]   ;;  %v3052_v1 = vld [vmem:[#allocation7 + $0x50] ss:$8 sps:$4 sm:$0xff]  }
  0xbc   :  { %1416 = vmatprep.subr.bf16.mxu0 %v2913_v0  ;;  %v2976_v0 = vld [vmem:[#allocation5 + $0x38c] ss:$16 sps:$4 sm:$0xff]  }
  0xbe   :  { %1503 = vmatpush1.bf16.msra.mxu1 %v2914_v3  ;;  %v2974_v3 = vld [vmem:[#allocation5 + $0x388] ss:$16 sps:$4 sm:$0xff]  }
  0xbf   :  { %1417 = vmatpush1.bf16.msra.mxu0 %v2911_v2  ;;  %1504 = vmatprep.subr.bf16.mxu1 %v2922_v5  ;;  %v3057_v2 = vld [vmem:[#allocation7 + $0x64] ss:$8 sps:$4 sm:$0xff]   ;;  %v3055_v5 = vld [vmem:[#allocation7 + $0x60] ss:$8 sps:$4 sm:$0xff]  }
  0xc0   :  { %1418 = vmatprep.subr.bf16.mxu0 %v2919_v4  ;;  %v2979_v4 = vld [vmem:[#allocation5 + $0x3ac] ss:$16 sps:$4 sm:$0xff]  }
  0xc2   :  { %1505 = vmatpush1.bf16.msra.mxu1 %v2920_v7  ;;  %v2977_v7 = vld [vmem:[#allocation5 + $0x3a8] ss:$16 sps:$4 sm:$0xff]  }
  0xc3   :  { %1419 = vmatpush1.bf16.msra.mxu0 %v2917_v6  ;;  %1506 = vmatprep.subr.bf16.mxu1 %v2928_v9  ;;  %v3060_v6 = vld [vmem:[#allocation7 + $0x74] ss:$8 sps:$4 sm:$0xff]   ;;  %v3058_v9 = vld [vmem:[#allocation7 + $0x70] ss:$8 sps:$4 sm:$0xff]  }
  0xc4   :  { %1420 = vmatprep.subr.bf16.mxu0 %v2925_v8  ;;  %v2982_v8 = vld [vmem:[#allocation5 + $0x3cc] ss:$16 sps:$4 sm:$0xff]  }
  0xc6   :  { %1507 = vmatpush1.bf16.msra.mxu1 %v2926_v11  ;;  %v2980_v11 = vld [vmem:[#allocation5 + $0x3c8] ss:$16 sps:$4 sm:$0xff]  }
  0xc7   :  { %1421 = vmatpush1.bf16.msra.mxu0 %v2923_v10  ;;  %1508 = vmatprep.subr.bf16.mxu1 %v2934_v14  ;;  %v3063_v10 = vld [vmem:[#allocation7 + $0x84] ss:$8 sps:$4 sm:$0xff]   ;;  %v3061_v14 = vld [vmem:[#allocation7 + $0x80] ss:$8 sps:$4 sm:$0xff]  }
  0xc8   :  { %1422 = vmatprep.subr.bf16.mxu0 %v2931_v13  ;;  %v2985_v13 = vld [vmem:[#allocation5 + $0x3ec] ss:$16 sps:$4 sm:$0xff]  }
  0xca   :  { %1509 = vmatpush1.bf16.msra.mxu1 %v2932_v17  ;;  %v2983_v17 = vld [vmem:[#allocation5 + $0x3e8] ss:$16 sps:$4 sm:$0xff]  }
  0xcb   :  { %1423 = vmatpush1.bf16.msra.mxu0 %v2929_v16  ;;  %1521 = vmatprep.subr.bf16.mxu1 %v2937_v20  ;;  %v3066_v16 = vld [vmem:[#allocation7 + $0x94] ss:$8 sps:$4 sm:$0xff]   ;;  %v3069_v20 = vld [vmem:[#allocation7 + $0xa4] ss:$8 sps:$4 sm:$0xff]  }
  0xcc   :  { %1435 = vmatprep.subr.bf16.mxu0 %v2943_v21  ;;  %v2986_v21 = vld [vmem:[#allocation5 + $0x408] ss:$16 sps:$4 sm:$0xff]  }
  0xcd   :  { %1511 = vmatmul.mubr.bf16.vlgmr.msra.gmra.mrb[4].mxu1 %v3378_v12  ;;  %v103_v12 = vpack.c.bf16 %v96_v32, %v89_v31  ;;  %v2997_v31 = vld [vmem:[#allocation5 + $0x46c] ss:$16 sps:$4 sm:$0xff]   ;;  %v3073_v32 = vld [vmem:[#allocation7 + $0xc0] ss:$8 sps:$4 sm:$0xff]  }
  0xce   :  { %1425 = vmatmul.mubr.bf16.vlgmr.msra.gmra.mrb[0].mxu0 %v3388_v22  ;;  %1522 = vmatpush1.bf16.msra.mxu1 %v2935_v23  ;;  %v2991_v23 = vld [vmem:[#allocation5 + $0x42c] ss:$16 sps:$4 sm:$0xff]  }
  0xcf   :  { %1436 = vmatpush1.bf16.msra.mxu0 %v2941_v24  ;;  %1523 = vmatprep.subr.bf16.mxu1 %v2940_v25  ;;  %v3067_v24 = vld [vmem:[#allocation7 + $0xa0] ss:$8 sps:$4 sm:$0xff]   ;;  %v3072_v25 = vld [vmem:[#allocation7 + $0xb4] ss:$8 sps:$4 sm:$0xff]  }
  0xd0   :  { %1467 = vmatprep.mubr.bf16.mxu0 %v3279_v28  ;;  %1553 = vmatprep.mubr.bf16.mxu1 %v3374_v55  ;;  %v2953_v55 = vld [vmem:[#allocation5 + $0x2a8] ss:$16 sps:$4 sm:$0xff]  }
  0xd1   :  { %1607 = vmatprep.subr.bf16.mxu0 %v3033_v29  ;;  %v3075_v29 = vld [vmem:[#allocation7 + $0xc4] ss:$8 sps:$4 sm:$0xff]  }
  0xd2   :  { %1524 = vmatpush1.bf16.msra.mxu1 %v2938_v26  ;;  %v2989_v26 = vld [vmem:[#allocation5 + $0x428] ss:$16 sps:$4 sm:$0xff]  }
  0xd3   :  { %1525 = vmatprep.subr.bf16.mxu1 %v2946_v27  ;;  %v2994_v27 = vld [vmem:[#allocation5 + $0x44c] ss:$16 sps:$4 sm:$0xff]  }
  0xd6   :  { %1526 = vmatpush1.bf16.msra.mxu1 %v2944_v30  ;;  %v2992_v30 = vld [vmem:[#allocation5 + $0x448] ss:$16 sps:$4 sm:$0xff]  }
  0xd7   :  { %1527 = vmatprep.subr.bf16.mxu1 %v2949_v33  ;;  %v2995_v33 = vld [vmem:[#allocation5 + $0x468] ss:$16 sps:$4 sm:$0xff]  }
  0xda   :  { %2575 = vmatmul.mubr.msk.bf16.vlgmr.msra.gmra.mrb[0].mxu0 %vm1302_vm0, %v103_v12  ;;  %1528 = vmatpush1.bf16.msra.mxu1 %v2947_v34  ;;  %v3003_v34 = vld [vmem:[#allocation5 + $0x4ac] ss:$16 sps:$4 sm:$0xff]  }
  0xdb   :  { %1608 = vmatpush1.bf16.msra.mxu0 %v3031_v35  ;;  %1529 = vmatprep.subr.bf16.mxu1 %v2952_v36  ;;  %v3001_v35 = vld [vmem:[#allocation5 + $0x4a8] ss:$16 sps:$4 sm:$0xff]  }
  0xdc   :  { %1639 = vmatprep.mubr.bf16.mxu0 %v3279_v28  ;;  %2074 = vmatprep.subr.bf16.mxu0 %v3039_v43  ;;  %v3070_v28 = vld [vmem:[#allocation7 + $0xb0] ss:$8 sps:$4 sm:$0xff]  }
  0xdd   :  { %v3004_v36 = vld [vmem:[#allocation5 + $0x4c8] ss:$16 sps:$4 sm:$0xff]  }
  0xde   :  { %1530 = vmatpush1.bf16.msra.mxu1 %v2950_v37  ;;  %v3009_v37 = vld [vmem:[#allocation5 + $0x4ec] ss:$16 sps:$4 sm:$0xff]   ;;  %v3013_v43 = vld [vmem:[#allocation5 + $0x528] ss:$16 sps:$4 sm:$0xff]  }
  0xdf   :  { %1531 = vmatprep.subr.bf16.mxu1 %v2955_v38  ;;  %v3007_v38 = vld [vmem:[#allocation5 + $0x4e8] ss:$16 sps:$4 sm:$0xff]  }
  0xe2   :  { %2576 = vmatmul.mubr.msk.bf16.vlgmr.msra.gmra.mrb[4].mxu0 %vm1302_vm0, %v103_v12  ;;  %1532 = vmatpush1.bf16.msra.mxu1 %v2953_v55  ;;  %v3006_v12 = vld [vmem:[#allocation5 + $0x4cc] ss:$16 sps:$4 sm:$0xff]  }
  0xe3   :  { %1533 = vmatprep.subr.bf16.mxu1 %v2958_v39  ;;  %2075 = vmatpush1.bf16.msra.mxu0 %v3037_v42  ;;  %v3012_v55 = vld [vmem:[#allocation5 + $0x50c] ss:$16 sps:$4 sm:$0xff]   ;;  %v3010_v39 = vld [vmem:[#allocation5 + $0x508] ss:$16 sps:$4 sm:$0xff]  }
  0xe4   :  { %2076 = vmatprep.subr.bf16.mxu0 %v3042_v45  ;;  %v3076_v42 = vld [vmem:[#allocation7 + $0xd0] ss:$8 sps:$4 sm:$0xff]   ;;  %v3081_v45 = vld [vmem:[#allocation7 + $0xe4] ss:$8 sps:$4 sm:$0xff]  }
  0xe6   :  { %1534 = vmatpush1.bf16.msra.mxu1 %v2956_v40  ;;  %v3078_v40 = vld [vmem:[#allocation7 + $0xd4] ss:$8 sps:$4 sm:$0xff]  }
  0xe7   :  { %1535 = vmatprep.subr.bf16.mxu1 %v2961_v41  ;;  %2077 = vmatpush1.bf16.msra.mxu0 %v3040_v48  ;;  %v3015_v41 = vld [vmem:[#allocation5 + $0x52c] ss:$16 sps:$4 sm:$0xff]   ;;  %v3016_v48 = vld [vmem:[#allocation5 + $0x548] ss:$16 sps:$4 sm:$0xff]  }
  0xe8   :  { %2078 = vmatprep.subr.bf16.mxu0 %v3045_v49  ;;  %v3084_v49 = vld [vmem:[#allocation7 + $0xf4] ss:$8 sps:$4 sm:$0xff]  }
  0xea   :  { %1536 = vmatpush1.bf16.msra.mxu1 %v2959_v46  ;;  %v3018_v46 = vld [vmem:[#allocation5 + $0x54c] ss:$16 sps:$4 sm:$0xff]  }
  0xeb   :  { %1537 = vmatprep.subr.bf16.mxu1 %v2964_v47  ;;  %2079 = vmatpush1.bf16.msra.mxu0 %v3043_v52  ;;  %v3079_v47 = vld [vmem:[#allocation7 + $0xe0] ss:$8 sps:$4 sm:$0xff]  }
  0xec   :  { %2080 = vmatprep.subr.bf16.mxu0 %v3048_v54  ;;  %v3019_v52 = vld [vmem:[#allocation5 + $0x568] ss:$16 sps:$4 sm:$0xff]   ;;  %v3087_v54 = vld [vmem:[#allocation7 + $0x104] ss:$8 sps:$4 sm:$0xff]  }
  0xee   :  { %1538 = vmatpush1.bf16.msra.mxu1 %v2962_v50  ;;  %v3021_v50 = vld [vmem:[#allocation5 + $0x56c] ss:$16 sps:$4 sm:$0xff]  }
  0xef   :  { %1539 = vmatprep.subr.bf16.mxu1 %v2967_v51  ;;  %2081 = vmatpush1.bf16.msra.mxu0 %v3046_v57  ;;  %v3082_v51 = vld [vmem:[#allocation7 + $0xf0] ss:$8 sps:$4 sm:$0xff]   ;;  %v3027_v57 = vld [vmem:[#allocation5 + $0x5ac] ss:$16 sps:$4 sm:$0xff]  }
  0xf0   :  { %2082 = vmatprep.subr.bf16.mxu0 %v3051_v58  ;;  %v3025_v58 = vld [vmem:[#allocation5 + $0x5a8] ss:$16 sps:$4 sm:$0xff]  }
  0xf2   :  { %1540 = vmatpush1.bf16.msra.mxu1 %v2965_v53  ;;  %v3024_v53 = vld [vmem:[#allocation5 + $0x58c] ss:$16 sps:$4 sm:$0xff]  }
  0xf3   :  { %1541 = vmatprep.subr.bf16.mxu1 %v2970_v56  ;;  %2083 = vmatpush1.bf16.msra.mxu0 %v3049_v61  ;;  %v3022_v56 = vld [vmem:[#allocation5 + $0x588] ss:$16 sps:$4 sm:$0xff]   ;;  %v3036_v61 = vld [vmem:[#allocation5 + $0x5ec] ss:$16 sps:$4 sm:$0xff]  }
  0xf4   :  { %2084 = vmatprep.subr.bf16.mxu0 %v3054_v62  ;;  %v3034_v62 = vld [vmem:[#allocation5 + $0x5e8] ss:$16 sps:$4 sm:$0xff]  }
  0xf6   :  { %1542 = vmatpush1.bf16.msra.mxu1 %v2968_v59  ;;  %v3030_v59 = vld [vmem:[#allocation5 + $0x5cc] ss:$16 sps:$4 sm:$0xff]  }
  0xf7   :  { %1543 = vmatprep.subr.bf16.mxu1 %v2973_v60  ;;  %2085 = vmatpush1.bf16.msra.mxu0 %v3052_v1  ;;  %v3028_v60 = vld [vmem:[#allocation5 + $0x5c8] ss:$16 sps:$4 sm:$0xff]  }
  0xf8   :  { %2086 = vmatprep.subr.bf16.mxu0 %v3057_v2 }
  0xfa   :  { %1544 = vmatpush1.bf16.msra.mxu1 %v2971_v63 }
  0xfb   :  { %1545 = vmatprep.subr.bf16.mxu1 %v2976_v0  ;;  %2087 = vmatpush1.bf16.msra.mxu0 %v3055_v5 }
  0xfc   :  { %2088 = vmatprep.subr.bf16.mxu0 %v3060_v6  ;;  %v3402_v6 = vld [vmem:[%s3454_s2] sm:$0xf] }
  0xfe   :  { %1546 = vmatpush1.bf16.msra.mxu1 %v2974_v3  ;;  %v302_v3 = vlaneseq }
  0xff   :  { %1547 = vmatprep.subr.bf16.mxu1 %v2979_v4  ;;  %2089 = vmatpush1.bf16.msra.mxu0 %v3058_v9 }
 0x100   :  { %2090 = vmatprep.subr.bf16.mxu0 %v3063_v10  ;;  %v3396_v4 = vshrl.u32 %v302_v3, 7  ;;  %v3120_v3 = vld [vmem:[#allocation7 + $0x1b4] ss:$8 sps:$4 sm:$0xff]  }
 0x102   :  { %1548 = vmatpush1.bf16.msra.mxu1 %v2977_v7  ;;  %v304_v5 = vsub.s32 0, %v3396_v4  ;;  %v308_v7 = vsub.s32 1, %v3396_v4 }
 0x103   :  { %1549 = vmatprep.subr.bf16.mxu1 %v2982_v8  ;;  %2091 = vmatpush1.bf16.msra.mxu0 %v3061_v14 }
 0x104   :  { %2092 = vmatprep.subr.bf16.mxu0 %v3066_v16  ;;  %v309_v8 = vrot.slane %v3402_v6, %v308_v7 }
 0x106   :  { %1550 = vmatpush1.bf16.msra.mxu1 %v2980_v11 }
 0x107   :  { %1551 = vmatprep.subr.bf16.mxu1 %v2985_v13  ;;  %2093 = vmatpush1.bf16.msra.mxu0 %v3064_v19 }
 0x108   :  { %2094 = vmatprep.subr.bf16.mxu0 %v3069_v20  ;;  %v3133_v20 = vld [vmem:[#allocation8 + $0x40] sm:$0xff]  }
 0x10a   :  { %1552 = vmatpush1.bf16.msra.mxu1 %v2983_v17 }
 0x10b   :  { %1564 = vmatprep.subr.bf16.mxu1 %v2988_v18  ;;  %2095 = vmatpush1.bf16.msra.mxu0 %v3067_v24 }
 0x10c   :  { %2096 = vmatprep.subr.bf16.mxu0 %v3072_v25 }
 0x10d   :  { %1554 = vmatmul.mubr.bf16.vlgmr.msra.gmra.mrb[4].mxu1 %v3380_v15  ;;  %v3000_v15 = vld [vmem:[#allocation5 + $0x48c] ss:$16 sps:$4 sm:$0xff]  }
 0x10e   :  { %1565 = vmatpush1.bf16.msra.mxu1 %v2986_v21  ;;  %1596 = vmatprep.mubr.bf16.mxu1 %v3385_v44  ;;  %v2998_v44 = vld [vmem:[#allocation5 + $0x488] ss:$16 sps:$4 sm:$0xff]   ;;  %v3134_v21 = vld [vmem:[#allocation8] sm:$0xff]  }
 0x10f   :  { %1566 = vmatprep.subr.bf16.mxu1 %v2991_v23  ;;  %2097 = vmatpush1.bf16.msra.mxu0 %v3070_v28  ;;  %v3135_v23 = vld [vmem:[#allocation8 + $0x48] sm:$0xff]  }
 0x110   :  { %2098 = vmatprep.subr.bf16.mxu0 %v3075_v29 }
 0x112   :  { %1567 = vmatpush1.bf16.msra.mxu1 %v2989_v26 }
 0x113   :  { %1568 = vmatprep.subr.bf16.mxu1 %v2994_v27  ;;  %2099 = vmatpush1.bf16.msra.mxu0 %v3073_v32  ;;  %v3137_v32 = vld [vmem:[#allocation8 + $0x50] sm:$0xff]  }
 0x114   :  { %2100 = vmatprep.subr.bf16.mxu0 %v3078_v40 }
 0x116   :  { %1569 = vmatpush1.bf16.msra.mxu1 %v2992_v30  ;;  %v3136_v30 = vld [vmem:[#allocation8 + $0x8] sm:$0xff]  }
 0x117   :  { %1570 = vmatprep.subr.bf16.mxu1 %v2997_v31  ;;  %2101 = vmatpush1.bf16.msra.mxu0 %v3076_v42 }
 0x118   :  { %2102 = vmatprep.subr.bf16.mxu0 %v3081_v45  ;;  %v3140_v45 = vld [vmem:[#allocation8 + $0x18] sm:$0xff]  }
 0x11a   :  { %1571 = vmatpush1.bf16.msra.mxu1 %v2995_v33 }
 0x11b   :  { %1572 = vmatprep.subr.bf16.mxu1 %v3000_v15  ;;  %2103 = vmatpush1.bf16.msra.mxu0 %v3079_v47  ;;  %v3141_v47 = vld [vmem:[#allocation8 + $0x60] sm:$0xff]  }
 0x11c   :  { %2104 = vmatprep.subr.bf16.mxu0 %v3084_v49  ;;  %v3142_v49 = vld [vmem:[#allocation8 + $0x20] sm:$0xff]  }
 0x11e   :  { %1573 = vmatpush1.bf16.msra.mxu1 %v2998_v44 }
 0x11f   :  { %1574 = vmatprep.subr.bf16.mxu1 %v3003_v34  ;;  %2105 = vmatpush1.bf16.msra.mxu0 %v3082_v51  ;;  %v3094_v51 = vld [vmem:[#allocation7 + $0x130] ss:$8 sps:$4 sm:$0xff]  }
 0x120   :  { %2117 = vmatprep.subr.bf16.mxu0 %v3087_v54  ;;  %v3102_v54 = vld [vmem:[#allocation7 + $0x154] ss:$8 sps:$4 sm:$0xff]  }
 0x122   :  { %1575 = vmatpush1.bf16.msra.mxu1 %v3001_v35 }
 0x123   :  { %1576 = vmatprep.subr.bf16.mxu1 %v3006_v12 }
 0x126   :  { %1577 = vmatpush1.bf16.msra.mxu1 %v3004_v36 }
 0x127   :  { %1578 = vmatprep.subr.bf16.mxu1 %v3009_v37  ;;  %v3085_v37 = vld [vmem:[#allocation7 + $0x100] ss:$8 sps:$4 sm:$0xff]  }
 0x12a   :  { %1579 = vmatpush1.bf16.msra.mxu1 %v3007_v38 }
 0x12b   :  { %1580 = vmatprep.subr.bf16.mxu1 %v3012_v55  ;;  %v3138_v55 = vld [vmem:[#allocation8 + $0x10] sm:$0xff]  }
 0x12e   :  { %1581 = vmatpush1.bf16.msra.mxu1 %v3010_v39  ;;  %v3090_v39 = vld [vmem:[#allocation7 + $0x114] ss:$8 sps:$4 sm:$0xff]  }
 0x12f   :  { %1582 = vmatprep.subr.bf16.mxu1 %v3015_v41  ;;  %v3139_v41 = vld [vmem:[#allocation8 + $0x58] sm:$0xff]  }
 0x132   :  { %1583 = vmatpush1.bf16.msra.mxu1 %v3013_v43  ;;  %v3088_v43 = vld [vmem:[#allocation7 + $0x110] ss:$8 sps:$4 sm:$0xff]  }
 0x133   :  { %1584 = vmatprep.subr.bf16.mxu1 %v3018_v46  ;;  %v3093_v46 = vld [vmem:[#allocation7 + $0x124] ss:$8 sps:$4 sm:$0xff]  }
 0x136   :  { %1585 = vmatpush1.bf16.msra.mxu1 %v3016_v48  ;;  %v3091_v48 = vld [vmem:[#allocation7 + $0x120] ss:$8 sps:$4 sm:$0xff]  }
 0x137   :  { %1586 = vmatprep.subr.bf16.mxu1 %v3021_v50  ;;  %v3096_v50 = vld [vmem:[#allocation7 + $0x134] ss:$8 sps:$4 sm:$0xff]  }
 0x13a   :  { %1587 = vmatpush1.bf16.msra.mxu1 %v3019_v52  ;;  %v3099_v52 = vld [vmem:[#allocation7 + $0x144] ss:$8 sps:$4 sm:$0xff]  }
 0x13b   :  { %1588 = vmatprep.subr.bf16.mxu1 %v3024_v53  ;;  %v3097_v53 = vld [vmem:[#allocation7 + $0x140] ss:$8 sps:$4 sm:$0xff]  }
 0x13e   :  { %1589 = vmatpush1.bf16.msra.mxu1 %v3022_v56  ;;  %v3100_v56 = vld [vmem:[#allocation7 + $0x150] ss:$8 sps:$4 sm:$0xff]  }
 0x13f   :  { %1590 = vmatprep.subr.bf16.mxu1 %v3027_v57  ;;  %v3105_v57 = vld [vmem:[#allocation7 + $0x164] ss:$8 sps:$4 sm:$0xff]  }
 0x142   :  { %1591 = vmatpush1.bf16.msra.mxu1 %v3025_v58  ;;  %v3103_v58 = vld [vmem:[#allocation7 + $0x160] ss:$8 sps:$4 sm:$0xff]  }
 0x143   :  { %1592 = vmatprep.subr.bf16.mxu1 %v3030_v59  ;;  %v3108_v59 = vld [vmem:[#allocation7 + $0x174] ss:$8 sps:$4 sm:$0xff]  }
 0x146   :  { %1593 = vmatpush1.bf16.msra.mxu1 %v3028_v60  ;;  %v3106_v60 = vld [vmem:[#allocation7 + $0x170] ss:$8 sps:$4 sm:$0xff]  }
 0x147   :  { %1594 = vmatprep.subr.bf16.mxu1 %v3036_v61  ;;  %v3111_v61 = vld [vmem:[#allocation7 + $0x184] ss:$8 sps:$4 sm:$0xff]  }
 0x14a   :  { %1595 = vmatpush1.bf16.msra.mxu1 %v3034_v62  ;;  %v3109_v62 = vld [vmem:[#allocation7 + $0x180] ss:$8 sps:$4 sm:$0xff]  }
 0x14b   :  { %2667 = vmatprep.subr.bf16.mxu1 %v3133_v20 }
 0x14d   :  { %1597 = vmatmul.mubr.bf16.vlgmr.msra.gmra.mrb[4].mxu1 %v3388_v22  ;;  %v305_v22 = vrot.slane %v3402_v6, %v304_v5 }
 0x14e   :  { %2668 = vmatpush3.bf16.msra.mxu1 %v3134_v21 }
 0x14f   :  { %2669 = vmatprep.subr.bf16.mxu1 %v3135_v23 }
 0x152   :  { %2670 = vmatpush3.bf16.msra.mxu1 %v3136_v30 }
 0x153   :  { %2671 = vmatprep.subr.bf16.mxu1 %v3137_v32 }
 0x156   :  { %2672 = vmatpush3.bf16.msra.mxu1 %v3138_v55 }
 0x157   :  { %2673 = vmatprep.subr.bf16.mxu1 %v3139_v41 }
 0x15a   :  { %2674 = vmatpush3.bf16.msra.mxu1 %v3140_v45  ;;  %v3146_v45 = vld [vmem:[#allocation8 + $0x30] sm:$0xff]  }
 0x15b   :  { %2675 = vmatprep.subr.bf16.mxu1 %v3141_v47  ;;  %v1742_v47 = vld [vmem:[%s3456_s4] sm:$0x3] }
 0x15e   :  { %2676 = vmatpush3.bf16.msra.mxu1 %v3142_v49  ;;  %v1751_v49 = vrot.slane %v1742_v47, %v308_v7 }
 0x160   :  { %v1340_v63 = vpop.f32.mrb[0].mxu1 }
 0x161   :  { %v1342_v0 = vpop.f32.mrb[1].mxu1  ;;  %v1341_v9 = vadd.f32 %v1340_v63, %v305_v22  ;;  %v3114_v63 = vld [vmem:[#allocation7 + $0x194] ss:$8 sps:$4 sm:$0xff]  }
 0x162   :  { %v1344_v1 = vpop.f32.mrb[2].mxu1  ;;  %v1343_v10 = vadd.f32 %v1342_v0, %v309_v8  ;;  %v3112_v0 = vld [vmem:[#allocation7 + $0x190] ss:$8 sps:$4 sm:$0xff]  }
 0x163   :  { %v1346_v2 = vpop.f32.mrb[3].mxu1  ;;  %v1345_v13 = vadd.f32 %v1344_v1, %v305_v22  ;;  %v3117_v1 = vld [vmem:[#allocation7 + $0x1a4] ss:$8 sps:$4 sm:$0xff]   ;;  %v3118_v22 = vld [vmem:[#allocation7 + $0x1b0] ss:$8 sps:$4 sm:$0xff]  }
 0x164   :  { %v1347_v17 = vadd.f32 %v1346_v2, %v309_v8  ;;  %v3115_v2 = vld [vmem:[#allocation7 + $0x1a0] ss:$8 sps:$4 sm:$0xff]   ;;  %v3123_v8 = vld [vmem:[#allocation7 + $0x1c4] ss:$8 sps:$4 sm:$0xff]  }
 0x1ad   :  { %v1469_v11 = vpop.f32.mrb[0].mxu0 }
 0x1ae   :  { %v2690_v14 = vadd.f32 %v1469_v11, %v1341_v9  ;;  %v1471_v16 = vpop.f32.mrb[1].mxu0  ;;  %v3121_v9 = vld [vmem:[#allocation7 + $0x1c0] ss:$8 sps:$4 sm:$0xff]   ;;  %v3124_v11 = vld [vmem:[#allocation7 + $0x1d0] ss:$8 sps:$4 sm:$0xff]  }
 0x1af   :  { %v2692_v18 = vadd.f32 %v1471_v16, %v1343_v10  ;;  %v1473_v19 = vpop.f32.mrb[2].mxu0  ;;  %v3126_v10 = vld [vmem:[#allocation7 + $0x1d4] ss:$8 sps:$4 sm:$0xff]  }
 0x1b0   :  { %v1658_v24 = vmul.f32 0.2, %v2690_v14  ;;  %v2694_v25 = vadd.f32 %v1473_v19, %v1345_v13  ;;  %v1475_v26 = vpop.f32.mrb[3].mxu0  ;;  %vm1650_vm1 = vcmp.ge.f32.partialorder %v2690_v14, 0.0  ;;  %v3129_v13 = vld [vmem:[#allocation7 + $0x1e4] ss:$8 sps:$4 sm:$0xff]  }
 0x1b1   :  { %v1659_v27 = vmul.f32 0.2, %v2692_v18  ;;  %v2696_v28 = vadd.f32 %v1475_v26, %v1347_v17  ;;  %vm1651_vm2 = vcmp.ge.f32.partialorder %v2692_v18, 0.0  ;;  %v3132_v16 = vld [vmem:[#allocation7 + $0x1f4] ss:$8 sps:$4 sm:$0xff]   ;;  %v316_v19 = vsub.s32 3, %v3396_v4 }
 0x1b2   :  { %vm1654_vm3 = vcmp.ge.f32.partialorder %v2694_v25, 0.0  ;;  %v1662_v29 = vmul.f32 0.2, %v2694_v25  ;;  %v1666_v33 = vsel %vm1650_vm1, %v2690_v14, %v1658_v24  ;;  %v3127_v14 = vld [vmem:[#allocation7 + $0x1e0] ss:$8 sps:$4 sm:$0xff]  }
 0x1b3   :  { %vm1655_vm4 = vcmp.ge.f32.partialorder %v2696_v28, 0.0  ;;  %v1663_v31 = vmul.f32 0.2, %v2696_v28  ;;  %v1667_v34 = vsel %vm1651_vm2, %v2692_v18, %v1659_v27  ;;  %v3130_v17 = vld [vmem:[#allocation7 + $0x1f0] ss:$8 sps:$4 sm:$0xff]   ;;  %v312_v18 = vsub.s32 2, %v3396_v4 }
 0x1b4   :  { %v1670_v15 = vsel %vm1654_vm3, %v2694_v25, %v1662_v29  ;;  %v317_v21 = vrot.slane %v3402_v6, %v316_v19 }
 0x1b5   :  { %v1674_v44 = vpack.c.bf16 %v1670_v15, %v1666_v33  ;;  %v1671_v35 = vsel %vm1655_vm4, %v2696_v28, %v1663_v31  ;;  %v3411_v12 = vpop.f32.mrb[4].mxu0  ;;  %v313_v20 = vrot.slane %v3402_v6, %v312_v18 }
 0x1b6   :  { %v1675_v36 = vpack.c.bf16 %v1671_v35, %v1667_v34  ;;  %v3413_v38 = vpop.f32.mrb[5].mxu0 }
 0x1b7   :  { %v3415_v40 = vpop.f32.mrb[6].mxu0 }
 0x1b8   :  { %2106 = vmatprep.mubr.bf16.mxu0 %v1675_v36  ;;  %v3417_v42 = vpop.f32.mrb[7].mxu0 }
 0x1b9   :  { %2107 = vmatmul.mubr.bf16.vlgmr.msra.gmra.mrb[8].mxu0 %v1674_v44 }
 0x1ba   :  { %2118 = vmatpush1.bf16.msra.mxu0 %v3085_v37 }
 0x1bb   :  { %2119 = vmatprep.subr.bf16.mxu0 %v3090_v39 }
 0x1be   :  { %2120 = vmatpush1.bf16.msra.mxu0 %v3088_v43  ;;  %v3144_v43 = vld [vmem:[#allocation8 + $0x28] sm:$0xff]  }
 0x1bf   :  { %2121 = vmatprep.subr.bf16.mxu0 %v3093_v46  ;;  %v3148_v46 = vld [vmem:[#allocation8 + $0x38] sm:$0xff]  }
 0x1c2   :  { %2122 = vmatpush1.bf16.msra.mxu0 %v3091_v48  ;;  %v1747_v48 = vrot.slane %v1742_v47, %v304_v5 }
 0x1c3   :  { %2123 = vmatprep.subr.bf16.mxu0 %v3096_v50 }
 0x1c6   :  { %2124 = vmatpush1.bf16.msra.mxu0 %v3094_v51 }
 0x1c7   :  { %2125 = vmatprep.subr.bf16.mxu0 %v3099_v52 }
 0x1ca   :  { %2126 = vmatpush1.bf16.msra.mxu0 %v3097_v53 }
 0x1cb   :  { %2127 = vmatprep.subr.bf16.mxu0 %v3102_v54 }
 0x1ce   :  { %2128 = vmatpush1.bf16.msra.mxu0 %v3100_v56 }
 0x1cf   :  { %2129 = vmatprep.subr.bf16.mxu0 %v3105_v57 }
 0x1d2   :  { %2130 = vmatpush1.bf16.msra.mxu0 %v3103_v58 }
 0x1d3   :  { %2131 = vmatprep.subr.bf16.mxu0 %v3108_v59 }
 0x1d6   :  { %2132 = vmatpush1.bf16.msra.mxu0 %v3106_v60 }
 0x1d7   :  { %2133 = vmatprep.subr.bf16.mxu0 %v3111_v61 }
 0x1da   :  { %2134 = vmatpush1.bf16.msra.mxu0 %v3109_v62 }
 0x1db   :  { %2135 = vmatprep.subr.bf16.mxu0 %v3114_v63 }
 0x1de   :  { %2136 = vmatpush1.bf16.msra.mxu0 %v3112_v0 }
 0x1df   :  { %2137 = vmatprep.subr.bf16.mxu0 %v3117_v1 }
 0x1e2   :  { %2138 = vmatpush1.bf16.msra.mxu0 %v3115_v2 }
 0x1e3   :  { %2139 = vmatprep.subr.bf16.mxu0 %v3120_v3 }
 0x1e6   :  { %2140 = vmatpush1.bf16.msra.mxu0 %v3118_v22 }
 0x1e7   :  { %2141 = vmatprep.subr.bf16.mxu0 %v3123_v8 }
 0x1ea   :  { %2142 = vmatpush1.bf16.msra.mxu0 %v3121_v9  ;;  %v2641_v9 = vld [vmem:[%s3458_s6] ss:$0 sm:$0xff] }
 0x1eb   :  { %2143 = vmatprep.subr.bf16.mxu0 %v3126_v10 }
 0x1ee   :  { %2144 = vmatpush1.bf16.msra.mxu0 %v3124_v11 }
 0x1ef   :  { %2145 = vmatprep.subr.bf16.mxu0 %v3129_v13 }
 0x1f2   :  { %2146 = vmatpush1.bf16.msra.mxu0 %v3127_v14 }
 0x1f3   :  { %2147 = vmatprep.subr.bf16.mxu0 %v3132_v16 }
 0x1f6   :  { %2148 = vmatpush1.bf16.msra.mxu0 %v3130_v17 }
 0x220   :  { %v1598_v23 = vpop.f32.mrb[4].mxu1 }
 0x221   :  { %v2697_v24 = vadd.f32 %v1598_v23, %v313_v20  ;;  %v1600_v25 = vpop.f32.mrb[5].mxu1 }
 0x222   :  { %v2699_v26 = vadd.f32 %v1600_v25, %v317_v21  ;;  %v1602_v27 = vpop.f32.mrb[6].mxu1 }
 0x223   :  { %v2698_v28 = vadd.f32 %v2697_v24, %v3411_v12  ;;  %v2701_v29 = vadd.f32 %v1602_v27, %v313_v20  ;;  %v1604_v30 = vpop.f32.mrb[7].mxu1 }
 0x224   :  { %v2700_v31 = vadd.f32 %v2699_v26, %v3413_v38  ;;  %v2703_v32 = vadd.f32 %v1604_v30, %v317_v21  ;;  %v3143_v38 = vld [vmem:[#allocation8 + $0x68] sm:$0xff]  }
 0x225   :  { %v1660_v33 = vmul.f32 0.2, %v2698_v28  ;;  %v2702_v15 = vadd.f32 %v2701_v29, %v3415_v40  ;;  %vm1652_vm5 = vcmp.ge.f32.partialorder %v2698_v28, 0.0  ;;  %2677 = vmatprep.subr.bf16.mxu1 %v3143_v38  ;;  %v3145_v40 = vld [vmem:[#allocation8 + $0x70] sm:$0xff]  }
 0x226   :  { %v1661_v44 = vmul.f32 0.2, %v2700_v31  ;;  %v2704_v34 = vadd.f32 %v2703_v32, %v3417_v42  ;;  %vm1653_vm6 = vcmp.ge.f32.partialorder %v2700_v31, 0.0  ;;  %2678 = vmatpush3.bf16.msra.mxu1 %v3144_v43  ;;  %v3147_v42 = vld [vmem:[#allocation8 + $0x78] sm:$0xff]  }
 0x227   :  { %vm1656_vm7 = vcmp.ge.f32.partialorder %v2702_v15, 0.0  ;;  %v1664_v6 = vmul.f32 0.2, %v2702_v15  ;;  %v1668_v36 = vsel %vm1652_vm5, %v2698_v28, %v1660_v33  ;;  %2679 = vmatprep.subr.bf16.mxu1 %v3145_v40 }
 0x228   :  { %vm1657_vm8 = vcmp.ge.f32.partialorder %v2704_v34, 0.0  ;;  %v1665_v35 = vmul.f32 0.2, %v2704_v34  ;;  %v1669_v12 = vsel %vm1653_vm6, %v2700_v31, %v1661_v44 }
 0x229   :  { %v1672_v37 = vsel %vm1656_vm7, %v2702_v15, %v1664_v6 }
 0x22a   :  { %v1673_v55 = vsel %vm1657_vm8, %v2704_v34, %v1665_v35  ;;  %v1676_v39 = vpack.c.bf16 %v1672_v37, %v1668_v36  ;;  %2680 = vmatpush3.bf16.msra.mxu1 %v3146_v45 }
 0x22b   :  { %v1677_v41 = vpack.c.bf16 %v1673_v55, %v1669_v12  ;;  %2681 = vmatprep.subr.bf16.mxu1 %v3147_v42 }
 0x22d   :  { %2149 = vmatprep.mubr.bf16.mxu0 %v1677_v41 }
 0x22e   :  { %2150 = vmatmul.mubr.bf16.vlgmr.msra.gmra.mrb[8].mxu0 %v1676_v39  ;;  %2682 = vmatpush3.bf16.msra.mxu1 %v3148_v46 }
 0x301   :  { %v2151_v50 = vpop.f32.mrb[8].mxu0 }
 0x302   :  { %v2705_v51 = vadd.f32 %v2151_v50, %v1747_v48  ;;  %v2153_v52 = vpop.f32.mrb[9].mxu0 }
 0x303   :  { %v2706_v53 = vadd.f32 %v2153_v52, %v1751_v49  ;;  %v2155_v54 = vpop.f32.mrb[10].mxu0 }
 0x304   :  { %v2164_v56 = vmul.f32 0.2, %v2705_v51  ;;  %v2707_v57 = vadd.f32 %v2155_v54, %v1747_v48  ;;  %v2157_v58 = vpop.f32.mrb[11].mxu0  ;;  %vm2160_vm9 = vcmp.ge.f32.partialorder %v2705_v51, 0.0 }
 0x305   :  { %v2165_v59 = vmul.f32 0.2, %v2706_v53  ;;  %v2708_v60 = vadd.f32 %v2157_v58, %v1751_v49  ;;  %vm2161_vm10 = vcmp.ge.f32.partialorder %v2706_v53, 0.0 }
 0x306   :  { %vm2162_vm11 = vcmp.ge.f32.partialorder %v2707_v57, 0.0  ;;  %v2166_v61 = vmul.f32 0.2, %v2707_v57  ;;  %v2168_v5 = vsel %vm2160_vm9, %v2705_v51, %v2164_v56 }
 0x307   :  { %vm2163_vm12 = vcmp.ge.f32.partialorder %v2708_v60, 0.0  ;;  %v2167_v62 = vmul.f32 0.2, %v2708_v60  ;;  %v2169_v7 = vsel %vm2161_vm10, %v2706_v53, %v2165_v59 }
 0x308   :  { %v2170_v63 = vsel %vm2162_vm11, %v2707_v57, %v2166_v61 }
 0x309   :  { %v2172_v4 = vpack.c.bf16 %v2170_v63, %v2168_v5  ;;  %v2171_v0 = vsel %vm2163_vm12, %v2708_v60, %v2167_v62 }
 0x30a   :  { %v2173_v1 = vpack.c.bf16 %v2171_v0, %v2169_v7 }
 0x30c   :  { %2341 = vmatprep.mubr.bf16.mxu1 %v2173_v1 }
 0x30d   :  { %2342 = vmatmul.mubr.bf16.vlgmr.msra.gmra.mrb[8].mxu1 %v2172_v4 }
 0x3e0   :  { %v2683_v2 = vpop.f32.mrb[8].mxu1 }
 0x3e1   :  { %v2684_v3 = vpop.f32.mrb[9].mxu1 }
 0x3e2   :  { %v2685_v22 = vadd.f32 %v2684_v3, %v2683_v2  ;;  %v2686_v8 = vpop.f32.mrb[10].mxu1 }
 0x3e3   :  { %v2687_v10 = vpop.f32.mrb[11].mxu1 }
 0x3e4   :  { %v2688_v11 = vadd.f32 %v2687_v10, %v2686_v8  ;;  %v2344_v13 = vadd.f32 %v2685_v22, %v2641_v9 }
 0x3e6   :  { %v2347_v14 = vadd.f32 %v2688_v11, %v2641_v9 }
 0x3e8   :  { %v2665_v16 = vpack.c.bf16 %v2347_v14, %v2344_v13 }
 0x3ea   :  { %2666 = vst [vmem:[#allocation10] sm:$0xff] %v2665_v16  }
 0x3eb   :  { %3248 = shalt.err (!%p3245_p8)
}
 0x3ec   :  { %s3249_s6 = scalar_lea.hbm %s3459_s7, 128 }
 0x3ed   :  { %p3250_p9 = scmp.ne.s32.totalorder %s3459_s7, %s3249_s6  ;;  %p3253_p10 = scmp.lt.u32.totalorder %s3249_s6, %s3459_s7 }
 0x3ef   :  { %p3255_p11 = pnand %p3253_p10, %p3250_p9 }
 0x3f1   :  { %3258 = shalt.err (!%p3255_p11)
}
 0x3f2   :  { %2371 = dma.vmem_to_hbm [thread:$0]  %s2366_s11, 128, %s3459_s7, [#allocation4], %s3277_s3, %s3277_s3, %s3278_s27  }
 0x3f3   :  { %3265 = dma.done.wait [#allocation4], 128  }
 0x3f4   :  { %3266 = vsyncadd [#allocation4], 4294967168 }
 0x3f5   :  { %2375 = vsyncpa [#allocation3], 1 }
 0x3f6   :  { %2376 = vsyncpa [#allocation6], 1 }
 0x3f7   :  { %2377 = vsyncpa [#allocation9], 1 }
 0x3f8   :  { %2378 = vsyncpa [#allocation4], 1 }

</bundles_post_ra>
